<compile_context>
chip_gen: v6e
topology: v6e:2x2x1
jax: 0.10.0
libtpu: 0.0.40
codegen_flags: <defaults>
</compile_context>

<pallas_src>
import jax
import jax.numpy as jnp
from jax import lax
from jax.experimental import pallas as pl
from jax.experimental.pallas import tpu as pltpu


def bigru_kernel(len_ref, x_ref, h0_ref,
                 wif_ref, whf_ref, bif_ref, bhf_ref,
                 wib_ref, whb_ref, bib_ref, bhb_ref,
                 out_ref, hfin_ref,
                 gif_scr, gib_scr):
    T, TB, E = x_ref.shape
    H = whf_ref.shape[0]
    G = 3 * H

    # ---- Phase 1: hoisted input projections (one big GEMM per direction) ----
    x2d = x_ref[...].reshape(T * TB, E)                      # bf16
    gi_f = jnp.dot(x2d, wif_ref[...], preferred_element_type=jnp.float32) + bif_ref[...]
    gi_b = jnp.dot(x2d, wib_ref[...], preferred_element_type=jnp.float32) + bib_ref[...]
    gif_scr[...] = gi_f.reshape(T, TB, G).astype(gif_scr.dtype)
    gib_scr[...] = gi_b.reshape(T, TB, G).astype(gib_scr.dtype)

    # Hoist weight / bias / length loads out of the recurrence.
    wh_f = whf_ref[...]
    wh_b = whb_ref[...]
    bh_f = bhf_ref[...]
    bh_b = bhb_ref[...]
    lens = len_ref[...]                                      # (TB, 1) int32

    def gru_step(gi, h, wh, bh):
        # PyTorch GRU cell, gate order [r, z, n].  Only this (TB,H)x(H,3H)
        # matmul remains inside the recurrence; h is carried in f32 and cast
        # to bf16 for the MXU (fine at small T; for very long sequences the
        # tiny w_hh matmul could be kept in f32 instead).
        gh = jnp.dot(h.astype(wh.dtype), wh,
                     preferred_element_type=jnp.float32) + bh
        r = jax.nn.sigmoid(gi[:, 0:H] + gh[:, 0:H])
        z = jax.nn.sigmoid(gi[:, H:2 * H] + gh[:, H:2 * H])
        n = jnp.tanh(gi[:, 2 * H:3 * H] + r * gh[:, 2 * H:3 * H])
        return (1.0 - z) * n + z * h

    # ---- Phase 2: interleaved fwd/bwd recurrence, direct out_ref writes -----
    def body(i, carry):
        h_f, h_b = carry
        tb = T - 1 - i

        # forward direction at time i
        hf_new = gru_step(gif_scr[i], h_f, wh_f, bh_f)
        vf = lens > i                                        # (TB, 1) bool
        out_ref[i, :, 0:H] = jnp.where(vf, hf_new, 0.0).astype(out_ref.dtype)
        h_f = jnp.where(vf, hf_new, h_f)                     # freeze past seq end

        # backward direction at time T-1-i (independent chain, overlaps fwd)
        hb_new = gru_step(gib_scr[tb], h_b, wh_b, bh_b)
        vb = lens > tb
        out_ref[tb, :, H:2 * H] = jnp.where(vb, hb_new, 0.0).astype(out_ref.dtype)
        h_b = jnp.where(vb, hb_new, h_b)
        return (h_f, h_b)

    unroll = True if T <= 32 else 8
    h_f, h_b = lax.fori_loop(0, T, body, (h0_ref[0], h0_ref[1]), unroll=unroll)

    hfin_ref[0] = h_f.astype(hfin_ref.dtype)
    hfin_ref[1] = h_b.astype(hfin_ref.dtype)


def _round_up(a, m):
    return (a + m - 1) // m * m


def encoder_rnn_forward(params, iput, hidden, lengths):
    """Equivalent of EncoderRNN.forward(iput, hidden, lengths).

    iput    : (B, T) int32 token ids
    hidden  : (2, B, H) float32 initial hidden
    lengths : (B,) int32, sorted descending, lengths[0] == T
    returns : output (B, T, 2H), hidden (2, B, H)
    """
    emb_w = params["embedding"]
    input_size, E = emb_w.shape
    H = params["w_hh_f"].shape[1]
    B, T = iput.shape
    G = 3 * H

    # Batch tile: grow with the batch (up to 128 sublanes) so the serial
    # recurrence matmul fills MXU rows; don't pad tiny batches up to 128.
    B8 = _round_up(B, 8)
    TB = min(128, B8)
    B_pad = _round_up(B, TB)
    pad = B_pad - B

    # iput.masked_fill(iput > num_embeddings, 3): same strict '>' as the torch
    # code (a token id exactly == num_embeddings would clamp in jnp.take where
    # torch would raise; kept deliberately identical to the module).
    tok = jnp.where(iput > input_size, jnp.int32(3), iput)
    # Embed directly into time-major (T, B, E); cast to bf16 — x is only
    # consumed by the bf16 Phase-1 GEMM, so this halves its HBM->VMEM DMA.
    x = jnp.take(emb_w, tok.T, axis=0).astype(jnp.bfloat16)  # (T, B, E)

    if pad:
        x = jnp.pad(x, ((0, 0), (0, pad), (0, 0)))
        hidden = jnp.pad(hidden, ((0, 0), (0, pad), (0, 0)))
        lengths = jnp.pad(lengths, ((0, pad),))               # padded rows: len 0
    len_col = lengths.astype(jnp.int32)[:, None]              # (B_pad, 1)

    bf16 = jnp.bfloat16
    args = (
        len_col, x, hidden,
        params["w_ih_f"].T.astype(bf16), params["w_hh_f"].T.astype(bf16),
        params["b_ih_f"][None, :], params["b_hh_f"][None, :],
        params["w_ih_b"].T.astype(bf16), params["w_hh_b"].T.astype(bf16),
        params["b_ih_b"][None, :], params["b_hh_b"][None, :],
    )

    full2d = lambda b: (0, 0)
    batch3d = lambda b: (0, b, 0)

    grid_spec = pltpu.PrefetchScalarGridSpec(
        num_scalar_prefetch=0,
        grid=(B_pad // TB,),
        in_specs=[
            pl.BlockSpec((TB, 1), lambda b: (b, 0)),          # lengths
            pl.BlockSpec((T, TB, E), batch3d),                # x (time-major, bf16)
            pl.BlockSpec((2, TB, H), batch3d),                # h0
            pl.BlockSpec((E, G), full2d),                     # w_ih fwd
            pl.BlockSpec((H, G), full2d),                     # w_hh fwd
            pl.BlockSpec((1, G), full2d),                     # b_ih fwd
            pl.BlockSpec((1, G), full2d),                     # b_hh fwd
            pl.BlockSpec((E, G), full2d),                     # w_ih bwd
            pl.BlockSpec((H, G), full2d),                     # w_hh bwd
            pl.BlockSpec((1, G), full2d),                     # b_ih bwd
            pl.BlockSpec((1, G), full2d),                     # b_hh bwd
        ],
        out_specs=(
            pl.BlockSpec((T, TB, 2 * H), batch3d),            # output (both dirs)
            pl.BlockSpec((2, TB, H), batch3d),                # final hidden
        ),
        scratch_shapes=[
            pltpu.VMEM((T, TB, G), jnp.bfloat16),             # gi fwd (hoisted GEMM)
            pltpu.VMEM((T, TB, G), jnp.bfloat16),             # gi bwd
        ],
    )

    # VMEM budget derived from the actual tile footprint; capped at 64 MiB so
    # the same configuration remains viable on v7x (64 MiB physical VMEM).
    tile_bytes = (
        2 * T * TB * G * 2            # gi scratches (bf16)
        + 2 * T * TB * E * 2          # x block, double-buffered (bf16)
        + 2 * T * TB * 2 * H * 4      # out block, double-buffered (f32)
        + 2 * 2 * (E + H + 2) * G * 4 # weights + biases, both dirs, dbl-buffered
        + 2 * 2 * TB * H * 4          # h0 + hfin blocks
    )
    vmem_limit = int(min(max(2 * tile_bytes, 32 << 20), 64 << 20))

    out_tm, hfin = pl.pallas_call(
        bigru_kernel,
        out_shape=(
            jax.ShapeDtypeStruct((T, B_pad, 2 * H), jnp.float32),
            jax.ShapeDtypeStruct((2, B_pad, H), jnp.float32),
        ),
        grid_spec=grid_spec,
        compiler_params=pltpu.CompilerParams(
            # batch tiles are independent -> megacore / v7x 2nd TC when B grows
            dimension_semantics=("parallel",),
            vmem_limit_bytes=vmem_limit,
        ),
    )(*args)

    # (T, B_pad, 2H) -> (B, T, 2H) batch_first; drop batch padding.
    output = jnp.transpose(out_tm, (1, 0, 2))[:B]
    return output, hfin[:, :B]


def encoder_rnn_reference(params, iput, hidden, lengths):
    """Pure-JAX f32 reference (packed-sequence semantics) for validation."""
    emb_w = params["embedding"]
    input_size, _ = emb_w.shape
    H = params["w_hh_f"].shape[1]
    B, T = iput.shape

    tok = jnp.where(iput > input_size, jnp.int32(3), iput)
    emb = jnp.take(emb_w, tok, axis=0)                      # (B, T, E)
    xs = jnp.transpose(emb, (1, 0, 2))                      # (T, B, E)
    ms = (jnp.arange(T)[:, None] < lengths[None, :])[:, :, None]  # (T, B, 1)

    def direction(wi, wh, bi, bh, h0, reverse):
        def cell(h, xt_m):
            x_t, m = xt_m
            gi = x_t @ wi.T + bi
            gh = h @ wh.T + bh
            r = jax.nn.sigmoid(gi[:, :H] + gh[:, :H])
            z = jax.nn.sigmoid(gi[:, H:2 * H] + gh[:, H:2 * H])
            n = jnp.tanh(gi[:, 2 * H:] + r * gh[:, 2 * H:])
            h_new = (1.0 - z) * n + z * h
            return jnp.where(m, h_new, h), jnp.where(m, h_new, 0.0)
        h_fin, outs = lax.scan(cell, h0, (xs, ms), reverse=reverse)
        return h_fin, outs

    hf, of = direction(params["w_ih_f"], params["w_hh_f"],
                       params["b_ih_f"], params["b_hh_f"], hidden[0], False)
    hb, ob = direction(params["w_ih_b"], params["w_hh_b"],
                       params["b_ih_b"], params["b_hh_b"], hidden[1], True)
    out = jnp.concatenate([of, ob], axis=-1)                # (T, B, 2H)
    return jnp.transpose(out, (1, 0, 2)), jnp.stack([hf, hb])


def _make_params(key, input_size, E, H):
    ks = jax.random.split(key, 9)
    return {
        # embedding.weight.data.normal_(0, 1/sqrt(embedding_size))
        "embedding": jax.random.normal(ks[0], (input_size, E), jnp.float32) / (E ** 0.5),
        # GRU params: weight_ih_l0 (3H,E), weight_hh_l0 (3H,H), biases (3H,) [fwd + reverse]
        "w_ih_f": 0.1 * jax.random.normal(ks[1], (3 * H, E), jnp.float32),
        "w_hh_f": 0.1 * jax.random.normal(ks[2], (3 * H, H), jnp.float32),
        "b_ih_f": 0.1 * jax.random.normal(ks[3], (3 * H,), jnp.float32),
        "b_hh_f": 0.1 * jax.random.normal(ks[4], (3 * H,), jnp.float32),
        "w_ih_b": 0.1 * jax.random.normal(ks[5], (3 * H, E), jnp.float32),
        "w_hh_b": 0.1 * jax.random.normal(ks[6], (3 * H, H), jnp.float32),
        "b_ih_b": 0.1 * jax.random.normal(ks[7], (3 * H,), jnp.float32),
        "b_hh_b": 0.1 * jax.random.normal(ks[8], (3 * H,), jnp.float32),
    }


if __name__ == "__main__":
    key = jax.random.PRNGKey(0)

    input_size = 16   # vocab size (nn.Embedding num_embeddings)
    E = 32            # embedding_size
    H = 32            # hidden_size

    kp, kt1, kt2 = jax.random.split(key, 3)
    params = _make_params(kp, input_size, E, H)
    fwd = jax.jit(encoder_rnn_forward)

    # ---- case 1: B=2, T=8 (includes an out-of-vocab token) ------------------
    B, T = 2, 8
    iput = jax.random.randint(kt1, (B, T), 0, input_size, dtype=jnp.int32)
    iput = iput.at[0, 0].set(input_size + 5)   # exercises masked_fill(> num_embeddings, 3)
    lengths = jnp.array([T, T - 3], dtype=jnp.int32)   # sorted descending, max == T
    hidden = jnp.zeros((2, B, H), jnp.float32)         # EncoderRNN.init_hidden

    output, hfin = fwd(params, iput, hidden, lengths)
    jax.block_until_ready((output, hfin))
    ref_out, ref_hid = encoder_rnn_reference(params, iput, hidden, lengths)

    assert output.shape == (B, T, 2 * H)
    assert hfin.shape == (2, B, H)
    # padded positions of the shorter sequence must be zero (pad_packed_sequence)
    assert bool(jnp.all(output[1, int(lengths[1]):, :] == 0.0))
    assert float(jnp.max(jnp.abs(output - ref_out))) < 5e-2
    assert float(jnp.max(jnp.abs(hfin - ref_hid))) < 5e-2

    # ---- case 2: B=10, T=12 (exercises batch padding / larger tile) ---------
    B2, T2 = 10, 12
    iput2 = jax.random.randint(kt2, (B2, T2), 0, input_size, dtype=jnp.int32)
    lengths2 = jnp.array([12, 12, 11, 9, 8, 7, 5, 4, 2, 1], dtype=jnp.int32)
    hidden2 = jnp.zeros((2, B2, H), jnp.float32)

    output2, hfin2 = fwd(params, iput2, hidden2, lengths2)
    jax.block_until_ready((output2, hfin2))
    ref_out2, ref_hid2 = encoder_rnn_reference(params, iput2, hidden2, lengths2)

    assert output2.shape == (B2, T2, 2 * H)
    assert bool(jnp.all(output2[-1, int(lengths2[-1]):, :] == 0.0))
    assert bool(jnp.all(output2[4, int(lengths2[4]):, :] == 0.0))
    assert float(jnp.max(jnp.abs(output2 - ref_out2))) < 5e-2
    assert float(jnp.max(jnp.abs(hfin2 - ref_hid2))) < 5e-2

    print("KERNEL_OK")
</pallas_src>

<mosaic_0001>
module attributes {stable_mosaic.version = 11 : i64} {
  func.func @bigru_kernel(%arg0: i32, %arg1: memref<8x1xi32, #tpu.memory_space<vmem>>, %arg2: memref<8x8x32xbf16, #tpu.memory_space<vmem>>, %arg3: memref<2x8x32xf32, #tpu.memory_space<vmem>>, %arg4: memref<32x96xbf16, #tpu.memory_space<vmem>>, %arg5: memref<32x96xbf16, #tpu.memory_space<vmem>>, %arg6: memref<1x96xf32, #tpu.memory_space<vmem>>, %arg7: memref<1x96xf32, #tpu.memory_space<vmem>>, %arg8: memref<32x96xbf16, #tpu.memory_space<vmem>>, %arg9: memref<32x96xbf16, #tpu.memory_space<vmem>>, %arg10: memref<1x96xf32, #tpu.memory_space<vmem>>, %arg11: memref<1x96xf32, #tpu.memory_space<vmem>>, %arg12: memref<8x8x64xf32, #tpu.memory_space<vmem>>, %arg13: memref<2x8x32xf32, #tpu.memory_space<vmem>>, %arg14: memref<8x8x96xbf16, #tpu.memory_space<vmem>>, %arg15: memref<8x8x96xbf16, #tpu.memory_space<vmem>>) attributes {dimension_semantics = [#tpu.dimension_semantics<parallel>], iteration_bounds = array<i64: 1>, scalar_prefetch = 0 : i64, scratch_operands = 2 : i64, tpu.core_type = #tpu.core_type<tc>, window_params = [{transform_indices = @transform_0, window_bounds = array<i64: 8, 1>}, {transform_indices = @transform_1, window_bounds = array<i64: 8, 8, 32>}, {transform_indices = @transform_2, window_bounds = array<i64: 2, 8, 32>}, {pipeline_mode = #tpu.pipeline_mode<synchronous>, transform_indices = @transform_3, window_bounds = array<i64: 32, 96>}, {pipeline_mode = #tpu.pipeline_mode<synchronous>, transform_indices = @transform_4, window_bounds = array<i64: 32, 96>}, {pipeline_mode = #tpu.pipeline_mode<synchronous>, transform_indices = @transform_5, window_bounds = array<i64: 1, 96>}, {pipeline_mode = #tpu.pipeline_mode<synchronous>, transform_indices = @transform_6, window_bounds = array<i64: 1, 96>}, {pipeline_mode = #tpu.pipeline_mode<synchronous>, transform_indices = @transform_7, window_bounds = array<i64: 32, 96>}, {pipeline_mode = #tpu.pipeline_mode<synchronous>, transform_indices = @transform_8, window_bounds = array<i64: 32, 96>}, {pipeline_mode = #tpu.pipeline_mode<synchronous>, transform_indices = @transform_9, window_bounds = array<i64: 1, 96>}, {pipeline_mode = #tpu.pipeline_mode<synchronous>, transform_indices = @transform_10, window_bounds = array<i64: 1, 96>}, {transform_indices = @transform_11, window_bounds = array<i64: 8, 8, 64>}, {transform_indices = @transform_12, window_bounds = array<i64: 2, 8, 32>}]} {
    %c0 = arith.constant 0 : index
    %c0_0 = arith.constant 0 : index
    %c0_1 = arith.constant 0 : index
    %0 = vector.load %arg2[%c0, %c0_0, %c0_1] : memref<8x8x32xbf16, #tpu.memory_space<vmem>>, vector<8x8x32xbf16>
    %1 = vector.shape_cast %0 : vector<8x8x32xbf16> to vector<64x32xbf16>
    %c0_2 = arith.constant 0 : index
    %c0_3 = arith.constant 0 : index
    %2 = vector.load %arg4[%c0_2, %c0_3] : memref<32x96xbf16, #tpu.memory_space<vmem>>, vector<32x96xbf16>
    %cst = arith.constant dense<0.000000e+00> : vector<64x96xf32>
    %3 = tpu.matmul %1, %2, %cst {dimension_numbers = #tpu.dot_dimension_numbers<[1], [0], [0], [1], [0, 0, 1, 1], [], []>} : vector<64x32xbf16>, vector<32x96xbf16>, vector<64x96xf32> -> vector<64x96xf32>
    %c0_4 = arith.constant 0 : index
    %c0_5 = arith.constant 0 : index
    %4 = vector.load %arg6[%c0_4, %c0_5] : memref<1x96xf32, #tpu.memory_space<vmem>>, vector<1x96xf32>
    %5 = vector.broadcast %4 : vector<1x96xf32> to vector<64x96xf32>
    %6 = arith.addf %3, %5 : vector<64x96xf32>
    %c0_6 = arith.constant 0 : index
    %c0_7 = arith.constant 0 : index
    %7 = vector.load %arg8[%c0_6, %c0_7] : memref<32x96xbf16, #tpu.memory_space<vmem>>, vector<32x96xbf16>
    %cst_8 = arith.constant dense<0.000000e+00> : vector<64x96xf32>
    %8 = tpu.matmul %1, %7, %cst_8 {dimension_numbers = #tpu.dot_dimension_numbers<[1], [0], [0], [1], [0, 0, 1, 1], [], []>} : vector<64x32xbf16>, vector<32x96xbf16>, vector<64x96xf32> -> vector<64x96xf32>
    %c0_9 = arith.constant 0 : index
    %c0_10 = arith.constant 0 : index
    %9 = vector.load %arg10[%c0_9, %c0_10] : memref<1x96xf32, #tpu.memory_space<vmem>>, vector<1x96xf32>
    %10 = vector.broadcast %9 : vector<1x96xf32> to vector<64x96xf32>
    %11 = arith.addf %8, %10 : vector<64x96xf32>
    %12 = vector.shape_cast %6 : vector<64x96xf32> to vector<8x8x96xf32>
    %13 = arith.truncf %12 : vector<8x8x96xf32> to vector<8x8x96xbf16>
    %c0_11 = arith.constant 0 : index
    %c0_12 = arith.constant 0 : index
    %c0_13 = arith.constant 0 : index
    %14 = vector.load %arg14[%c0_11, %c0_12, %c0_13] : memref<8x8x96xbf16, #tpu.memory_space<vmem>>, vector<8x8x96xbf16>
    tpu.vector_store %arg14[%c0_11, %c0_12, %c0_13], %13 {strides = array<i32>} : memref<8x8x96xbf16, #tpu.memory_space<vmem>>, vector<8x8x96xbf16>,
    %15 = vector.shape_cast %11 : vector<64x96xf32> to vector<8x8x96xf32>
    %16 = arith.truncf %15 : vector<8x8x96xf32> to vector<8x8x96xbf16>
    %c0_14 = arith.constant 0 : index
    %c0_15 = arith.constant 0 : index
    %c0_16 = arith.constant 0 : index
    %17 = vector.load %arg15[%c0_14, %c0_15, %c0_16] : memref<8x8x96xbf16, #tpu.memory_space<vmem>>, vector<8x8x96xbf16>
    tpu.vector_store %arg15[%c0_14, %c0_15, %c0_16], %16 {strides = array<i32>} : memref<8x8x96xbf16, #tpu.memory_space<vmem>>, vector<8x8x96xbf16>,
    %c0_17 = arith.constant 0 : index
    %c0_18 = arith.constant 0 : index
    %18 = vector.load %arg5[%c0_17, %c0_18] : memref<32x96xbf16, #tpu.memory_space<vmem>>, vector<32x96xbf16>
    %c0_19 = arith.constant 0 : index
    %c0_20 = arith.constant 0 : index
    %19 = vector.load %arg9[%c0_19, %c0_20] : memref<32x96xbf16, #tpu.memory_space<vmem>>, vector<32x96xbf16>
    %c0_21 = arith.constant 0 : index
    %c0_22 = arith.constant 0 : index
    %20 = vector.load %arg7[%c0_21, %c0_22] : memref<1x96xf32, #tpu.memory_space<vmem>>, vector<1x96xf32>
    %c0_23 = arith.constant 0 : index
    %c0_24 = arith.constant 0 : index
    %21 = vector.load %arg11[%c0_23, %c0_24] : memref<1x96xf32, #tpu.memory_space<vmem>>, vector<1x96xf32>
    %c0_25 = arith.constant 0 : index
    %c0_26 = arith.constant 0 : index
    %22 = vector.load %arg1[%c0_25, %c0_26] : memref<8x1xi32, #tpu.memory_space<vmem>>, vector<8x1xi32>
    %c0_27 = arith.constant 0 : index
    %c0_28 = arith.constant 0 : index
    %c0_29 = arith.constant 0 : index
    %23 = vector.load %arg3[%c0_27, %c0_28, %c0_29] : memref<2x8x32xf32, #tpu.memory_space<vmem>>, vector<1x8x32xf32>
    %24 = vector.shape_cast %23 : vector<1x8x32xf32> to vector<8x32xf32>
    %c1 = arith.constant 1 : index
    %c0_30 = arith.constant 0 : index
    %c0_31 = arith.constant 0 : index
    %25 = vector.load %arg3[%c1, %c0_30, %c0_31] : memref<2x8x32xf32, #tpu.memory_space<vmem>>, vector<1x8x32xf32>
    %26 = vector.shape_cast %25 : vector<1x8x32xf32> to vector<8x32xf32>
    %c0_i32 = arith.constant 0 : i32
    %c7_i32 = arith.constant 7 : i32
    %27 = arith.subi %c7_i32, %c0_i32 : i32
    %28 = arith.index_cast %c0_i32 : i32 to index
    %c0_32 = arith.constant 0 : index
    %c0_33 = arith.constant 0 : index
    %29 = vector.load %arg14[%28, %c0_32, %c0_33] : memref<8x8x96xbf16, #tpu.memory_space<vmem>>, vector<1x8x96xbf16>
    %30 = vector.shape_cast %29 : vector<1x8x96xbf16> to vector<8x96xbf16>
    %31 = arith.truncf %24 : vector<8x32xf32> to vector<8x32xbf16>
    %cst_34 = arith.constant dense<0.000000e+00> : vector<8x96xf32>
    %32 = tpu.matmul %31, %18, %cst_34 {dimension_numbers = #tpu.dot_dimension_numbers<[1], [0], [0], [1], [0, 0, 1, 1], [], []>} : vector<8x32xbf16>, vector<32x96xbf16>, vector<8x96xf32> -> vector<8x96xf32>
    %33 = vector.broadcast %20 : vector<1x96xf32> to vector<8x96xf32>
    %34 = arith.addf %32, %33 : vector<8x96xf32>
    %35 = vector.extract_strided_slice %30 {offsets = [0, 0], sizes = [8, 32], strides = [1, 1]} : vector<8x96xbf16> to vector<8x32xbf16>
    %36 = vector.extract_strided_slice %34 {offsets = [0, 0], sizes = [8, 32], strides = [1, 1]} : vector<8x96xf32> to vector<8x32xf32>
    %37 = arith.extf %35 : vector<8x32xbf16> to vector<8x32xf32>
    %38 = arith.addf %37, %36 : vector<8x32xf32>
    %39 = arith.negf %38 : vector<8x32xf32>
    %40 = math.exp %39 : vector<8x32xf32>
    %cst_35 = arith.constant 1.000000e+00 : f32
    %41 = vector.broadcast %cst_35 : f32 to vector<8x32xf32>
    %42 = arith.addf %41, %40 : vector<8x32xf32>
    %43 = arith.divf %41, %42 : vector<8x32xf32>
    %44 = vector.extract_strided_slice %30 {offsets = [0, 32], sizes = [8, 32], strides = [1, 1]} : vector<8x96xbf16> to vector<8x32xbf16>
    %45 = vector.extract_strided_slice %34 {offsets = [0, 32], sizes = [8, 32], strides = [1, 1]} : vector<8x96xf32> to vector<8x32xf32>
    %46 = arith.extf %44 : vector<8x32xbf16> to vector<8x32xf32>
    %47 = arith.addf %46, %45 : vector<8x32xf32>
    %48 = arith.negf %47 : vector<8x32xf32>
    %49 = math.exp %48 : vector<8x32xf32>
    %cst_36 = arith.constant 1.000000e+00 : f32
    %50 = vector.broadcast %cst_36 : f32 to vector<8x32xf32>
    %51 = arith.addf %50, %49 : vector<8x32xf32>
    %52 = arith.divf %50, %51 : vector<8x32xf32>
    %53 = vector.extract_strided_slice %30 {offsets = [0, 64], sizes = [8, 32], strides = [1, 1]} : vector<8x96xbf16> to vector<8x32xbf16>
    %54 = vector.extract_strided_slice %34 {offsets = [0, 64], sizes = [8, 32], strides = [1, 1]} : vector<8x96xf32> to vector<8x32xf32>
    %55 = arith.mulf %43, %54 : vector<8x32xf32>
    %56 = arith.extf %53 : vector<8x32xbf16> to vector<8x32xf32>
    %57 = arith.addf %56, %55 : vector<8x32xf32>
    %58 = math.tanh %57 : vector<8x32xf32>
    %cst_37 = arith.constant 1.000000e+00 : f32
    %59 = vector.broadcast %cst_37 : f32 to vector<8x32xf32>
    %60 = arith.subf %59, %52 : vector<8x32xf32>
    %61 = arith.mulf %60, %58 : vector<8x32xf32>
    %62 = arith.mulf %52, %24 : vector<8x32xf32>
    %63 = arith.addf %61, %62 : vector<8x32xf32>
    %64 = vector.broadcast %c0_i32 : i32 to vector<8x1xi32>
    %65 = arith.cmpi sgt, %22, %64 : vector<8x1xi32>
    %cst_38 = arith.constant 0.000000e+00 : f32
    %66 = vector.shape_cast %65 : vector<8x1xi1> to vector<8x1xi1>
    %67 = vector.broadcast %66 : vector<8x1xi1> to vector<8x32xi1>
    %68 = vector.broadcast %cst_38 : f32 to vector<8x32xf32>
    %69 = arith.select %67, %63, %68 : vector<8x32xi1>, vector<8x32xf32>
    %70 = arith.index_cast %c0_i32 : i32 to index
    %c0_39 = arith.constant 0 : index
    %c0_40 = arith.constant 0 : index
    %71 = vector.load %arg12[%70, %c0_39, %c0_40] : memref<8x8x64xf32, #tpu.memory_space<vmem>>, vector<1x8x32xf32>
    %72 = vector.shape_cast %71 : vector<1x8x32xf32> to vector<8x32xf32>
    %73 = vector.shape_cast %69 : vector<8x32xf32> to vector<1x8x32xf32>
    tpu.vector_store %arg12[%70, %c0_39, %c0_40], %73 {strides = array<i32>} : memref<8x8x64xf32, #tpu.memory_space<vmem>>, vector<1x8x32xf32>,
    %74 = vector.shape_cast %65 : vector<8x1xi1> to vector<8x1xi1>
    %75 = vector.broadcast %74 : vector<8x1xi1> to vector<8x32xi1>
    %76 = arith.select %75, %63, %24 : vector<8x32xi1>, vector<8x32xf32>
    %77 = arith.index_cast %27 : i32 to index
    %c0_41 = arith.constant 0 : index
    %c0_42 = arith.constant 0 : index
    %78 = vector.load %arg15[%77, %c0_41, %c0_42] : memref<8x8x96xbf16, #tpu.memory_space<vmem>>, vector<1x8x96xbf16>
    %79 = vector.shape_cast %78 : vector<1x8x96xbf16> to vector<8x96xbf16>
    %80 = arith.truncf %26 : vector<8x32xf32> to vector<8x32xbf16>
    %cst_43 = arith.constant dense<0.000000e+00> : vector<8x96xf32>
    %81 = tpu.matmul %80, %19, %cst_43 {dimension_numbers = #tpu.dot_dimension_numbers<[1], [0], [0], [1], [0, 0, 1, 1], [], []>} : vector<8x32xbf16>, vector<32x96xbf16>, vector<8x96xf32> -> vector<8x96xf32>
    %82 = vector.broadcast %21 : vector<1x96xf32> to vector<8x96xf32>
    %83 = arith.addf %81, %82 : vector<8x96xf32>
    %84 = vector.extract_strided_slice %79 {offsets = [0, 0], sizes = [8, 32], strides = [1, 1]} : vector<8x96xbf16> to vector<8x32xbf16>
    %85 = vector.extract_strided_slice %83 {offsets = [0, 0], sizes = [8, 32], strides = [1, 1]} : vector<8x96xf32> to vector<8x32xf32>
    %86 = arith.extf %84 : vector<8x32xbf16> to vector<8x32xf32>
    %87 = arith.addf %86, %85 : vector<8x32xf32>
    %88 = arith.negf %87 : vector<8x32xf32>
    %89 = math.exp %88 : vector<8x32xf32>
    %cst_44 = arith.constant 1.000000e+00 : f32
    %90 = vector.broadcast %cst_44 : f32 to vector<8x32xf32>
    %91 = arith.addf %90, %89 : vector<8x32xf32>
    %92 = arith.divf %90, %91 : vector<8x32xf32>
    %93 = vector.extract_strided_slice %79 {offsets = [0, 32], sizes = [8, 32], strides = [1, 1]} : vector<8x96xbf16> to vector<8x32xbf16>
    %94 = vector.extract_strided_slice %83 {offsets = [0, 32], sizes = [8, 32], strides = [1, 1]} : vector<8x96xf32> to vector<8x32xf32>
    %95 = arith.extf %93 : vector<8x32xbf16> to vector<8x32xf32>
    %96 = arith.addf %95, %94 : vector<8x32xf32>
    %97 = arith.negf %96 : vector<8x32xf32>
    %98 = math.exp %97 : vector<8x32xf32>
    %cst_45 = arith.constant 1.000000e+00 : f32
    %99 = vector.broadcast %cst_45 : f32 to vector<8x32xf32>
    %100 = arith.addf %99, %98 : vector<8x32xf32>
    %101 = arith.divf %99, %100 : vector<8x32xf32>
    %102 = vector.extract_strided_slice %79 {offsets = [0, 64], sizes = [8, 32], strides = [1, 1]} : vector<8x96xbf16> to vector<8x32xbf16>
    %103 = vector.extract_strided_slice %83 {offsets = [0, 64], sizes = [8, 32], strides = [1, 1]} : vector<8x96xf32> to vector<8x32xf32>
    %104 = arith.mulf %92, %103 : vector<8x32xf32>
    %105 = arith.extf %102 : vector<8x32xbf16> to vector<8x32xf32>
    %106 = arith.addf %105, %104 : vector<8x32xf32>
    %107 = math.tanh %106 : vector<8x32xf32>
    %cst_46 = arith.constant 1.000000e+00 : f32
    %108 = vector.broadcast %cst_46 : f32 to vector<8x32xf32>
    %109 = arith.subf %108, %101 : vector<8x32xf32>
    %110 = arith.mulf %109, %107 : vector<8x32xf32>
    %111 = arith.mulf %101, %26 : vector<8x32xf32>
    %112 = arith.addf %110, %111 : vector<8x32xf32>
    %113 = vector.broadcast %27 : i32 to vector<8x1xi32>
    %114 = arith.cmpi sgt, %22, %113 : vector<8x1xi32>
    %cst_47 = arith.constant 0.000000e+00 : f32
    %115 = vector.shape_cast %114 : vector<8x1xi1> to vector<8x1xi1>
    %116 = vector.broadcast %115 : vector<8x1xi1> to vector<8x32xi1>
    %117 = vector.broadcast %cst_47 : f32 to vector<8x32xf32>
    %118 = arith.select %116, %112, %117 : vector<8x32xi1>, vector<8x32xf32>
    %119 = arith.index_cast %27 : i32 to index
    %c0_48 = arith.constant 0 : index
    %c32 = arith.constant 32 : index
    %120 = vector.load %arg12[%119, %c0_48, %c32] : memref<8x8x64xf32, #tpu.memory_space<vmem>>, vector<1x8x32xf32>
    %121 = vector.shape_cast %120 : vector<1x8x32xf32> to vector<8x32xf32>
    %122 = vector.shape_cast %118 : vector<8x32xf32> to vector<1x8x32xf32>
    tpu.vector_store %arg12[%119, %c0_48, %c32], %122 {strides = array<i32>} : memref<8x8x64xf32, #tpu.memory_space<vmem>>, vector<1x8x32xf32>,
    %123 = vector.shape_cast %114 : vector<8x1xi1> to vector<8x1xi1>
    %124 = vector.broadcast %123 : vector<8x1xi1> to vector<8x32xi1>
    %125 = arith.select %124, %112, %26 : vector<8x32xi1>, vector<8x32xf32>
    %c1_i32 = arith.constant 1 : i32
    %c7_i32_49 = arith.constant 7 : i32
    %126 = arith.subi %c7_i32_49, %c1_i32 : i32
    %127 = arith.index_cast %c1_i32 : i32 to index
    %c0_50 = arith.constant 0 : index
    %c0_51 = arith.constant 0 : index
    %128 = vector.load %arg14[%127, %c0_50, %c0_51] : memref<8x8x96xbf16, #tpu.memory_space<vmem>>, vector<1x8x96xbf16>
    %129 = vector.shape_cast %128 : vector<1x8x96xbf16> to vector<8x96xbf16>
    %130 = arith.truncf %76 : vector<8x32xf32> to vector<8x32xbf16>
    %cst_52 = arith.constant dense<0.000000e+00> : vector<8x96xf32>
    %131 = tpu.matmul %130, %18, %cst_52 {dimension_numbers = #tpu.dot_dimension_numbers<[1], [0], [0], [1], [0, 0, 1, 1], [], []>} : vector<8x32xbf16>, vector<32x96xbf16>, vector<8x96xf32> -> vector<8x96xf32>
    %132 = vector.broadcast %20 : vector<1x96xf32> to vector<8x96xf32>
    %133 = arith.addf %131, %132 : vector<8x96xf32>
    %134 = vector.extract_strided_slice %129 {offsets = [0, 0], sizes = [8, 32], strides = [1, 1]} : vector<8x96xbf16> to vector<8x32xbf16>
    %135 = vector.extract_strided_slice %133 {offsets = [0, 0], sizes = [8, 32], strides = [1, 1]} : vector<8x96xf32> to vector<8x32xf32>
    %136 = arith.extf %134 : vector<8x32xbf16> to vector<8x32xf32>
    %137 = arith.addf %136, %135 : vector<8x32xf32>
    %138 = arith.negf %137 : vector<8x32xf32>
    %139 = math.exp %138 : vector<8x32xf32>
    %cst_53 = arith.constant 1.000000e+00 : f32
    %140 = vector.broadcast %cst_53 : f32 to vector<8x32xf32>
    %141 = arith.addf %140, %139 : vector<8x32xf32>
    %142 = arith.divf %140, %141 : vector<8x32xf32>
    %143 = vector.extract_strided_slice %129 {offsets = [0, 32], sizes = [8, 32], strides = [1, 1]} : vector<8x96xbf16> to vector<8x32xbf16>
    %144 = vector.extract_strided_slice %133 {offsets = [0, 32], sizes = [8, 32], strides = [1, 1]} : vector<8x96xf32> to vector<8x32xf32>
    %145 = arith.extf %143 : vector<8x32xbf16> to vector<8x32xf32>
    %146 = arith.addf %145, %144 : vector<8x32xf32>
    %147 = arith.negf %146 : vector<8x32xf32>
    %148 = math.exp %147 : vector<8x32xf32>
    %cst_54 = arith.constant 1.000000e+00 : f32
    %149 = vector.broadcast %cst_54 : f32 to vector<8x32xf32>
    %150 = arith.addf %149, %148 : vector<8x32xf32>
    %151 = arith.divf %149, %150 : vector<8x32xf32>
    %152 = vector.extract_strided_slice %129 {offsets = [0, 64], sizes = [8, 32], strides = [1, 1]} : vector<8x96xbf16> to vector<8x32xbf16>
    %153 = vector.extract_strided_slice %133 {offsets = [0, 64], sizes = [8, 32], strides = [1, 1]} : vector<8x96xf32> to vector<8x32xf32>
    %154 = arith.mulf %142, %153 : vector<8x32xf32>
    %155 = arith.extf %152 : vector<8x32xbf16> to vector<8x32xf32>
    %156 = arith.addf %155, %154 : vector<8x32xf32>
    %157 = math.tanh %156 : vector<8x32xf32>
    %cst_55 = arith.constant 1.000000e+00 : f32
    %158 = vector.broadcast %cst_55 : f32 to vector<8x32xf32>
    %159 = arith.subf %158, %151 : vector<8x32xf32>
    %160 = arith.mulf %159, %157 : vector<8x32xf32>
    %161 = arith.mulf %151, %76 : vector<8x32xf32>
    %162 = arith.addf %160, %161 : vector<8x32xf32>
    %163 = vector.broadcast %c1_i32 : i32 to vector<8x1xi32>
    %164 = arith.cmpi sgt, %22, %163 : vector<8x1xi32>
    %cst_56 = arith.constant 0.000000e+00 : f32
    %165 = vector.shape_cast %164 : vector<8x1xi1> to vector<8x1xi1>
    %166 = vector.broadcast %165 : vector<8x1xi1> to vector<8x32xi1>
    %167 = vector.broadcast %cst_56 : f32 to vector<8x32xf32>
    %168 = arith.select %166, %162, %167 : vector<8x32xi1>, vector<8x32xf32>
    %169 = arith.index_cast %c1_i32 : i32 to index
    %c0_57 = arith.constant 0 : index
    %c0_58 = arith.constant 0 : index
    %170 = vector.load %arg12[%169, %c0_57, %c0_58] : memref<8x8x64xf32, #tpu.memory_space<vmem>>, vector<1x8x32xf32>
    %171 = vector.shape_cast %170 : vector<1x8x32xf32> to vector<8x32xf32>
    %172 = vector.shape_cast %168 : vector<8x32xf32> to vector<1x8x32xf32>
    tpu.vector_store %arg12[%169, %c0_57, %c0_58], %172 {strides = array<i32>} : memref<8x8x64xf32, #tpu.memory_space<vmem>>, vector<1x8x32xf32>,
    %173 = vector.shape_cast %164 : vector<8x1xi1> to vector<8x1xi1>
    %174 = vector.broadcast %173 : vector<8x1xi1> to vector<8x32xi1>
    %175 = arith.select %174, %162, %76 : vector<8x32xi1>, vector<8x32xf32>
    %176 = arith.index_cast %126 : i32 to index
    %c0_59 = arith.constant 0 : index
    %c0_60 = arith.constant 0 : index
    %177 = vector.load %arg15[%176, %c0_59, %c0_60] : memref<8x8x96xbf16, #tpu.memory_space<vmem>>, vector<1x8x96xbf16>
    %178 = vector.shape_cast %177 : vector<1x8x96xbf16> to vector<8x96xbf16>
    %179 = arith.truncf %125 : vector<8x32xf32> to vector<8x32xbf16>
    %cst_61 = arith.constant dense<0.000000e+00> : vector<8x96xf32>
    %180 = tpu.matmul %179, %19, %cst_61 {dimension_numbers = #tpu.dot_dimension_numbers<[1], [0], [0], [1], [0, 0, 1, 1], [], []>} : vector<8x32xbf16>, vector<32x96xbf16>, vector<8x96xf32> -> vector<8x96xf32>
    %181 = vector.broadcast %21 : vector<1x96xf32> to vector<8x96xf32>
    %182 = arith.addf %180, %181 : vector<8x96xf32>
    %183 = vector.extract_strided_slice %178 {offsets = [0, 0], sizes = [8, 32], strides = [1, 1]} : vector<8x96xbf16> to vector<8x32xbf16>
    %184 = vector.extract_strided_slice %182 {offsets = [0, 0], sizes = [8, 32], strides = [1, 1]} : vector<8x96xf32> to vector<8x32xf32>
    %185 = arith.extf %183 : vector<8x32xbf16> to vector<8x32xf32>
    %186 = arith.addf %185, %184 : vector<8x32xf32>
    %187 = arith.negf %186 : vector<8x32xf32>
    %188 = math.exp %187 : vector<8x32xf32>
    %cst_62 = arith.constant 1.000000e+00 : f32
    %189 = vector.broadcast %cst_62 : f32 to vector<8x32xf32>
    %190 = arith.addf %189, %188 : vector<8x32xf32>
    %191 = arith.divf %189, %190 : vector<8x32xf32>
    %192 = vector.extract_strided_slice %178 {offsets = [0, 32], sizes = [8, 32], strides = [1, 1]} : vector<8x96xbf16> to vector<8x32xbf16>
    %193 = vector.extract_strided_slice %182 {offsets = [0, 32], sizes = [8, 32], strides = [1, 1]} : vector<8x96xf32> to vector<8x32xf32>
    %194 = arith.extf %192 : vector<8x32xbf16> to vector<8x32xf32>
    %195 = arith.addf %194, %193 : vector<8x32xf32>
    %196 = arith.negf %195 : vector<8x32xf32>
    %197 = math.exp %196 : vector<8x32xf32>
    %cst_63 = arith.constant 1.000000e+00 : f32
    %198 = vector.broadcast %cst_63 : f32 to vector<8x32xf32>
    %199 = arith.addf %198, %197 : vector<8x32xf32>
    %200 = arith.divf %198, %199 : vector<8x32xf32>
    %201 = vector.extract_strided_slice %178 {offsets = [0, 64], sizes = [8, 32], strides = [1, 1]} : vector<8x96xbf16> to vector<8x32xbf16>
    %202 = vector.extract_strided_slice %182 {offsets = [0, 64], sizes = [8, 32], strides = [1, 1]} : vector<8x96xf32> to vector<8x32xf32>
    %203 = arith.mulf %191, %202 : vector<8x32xf32>
    %204 = arith.extf %201 : vector<8x32xbf16> to vector<8x32xf32>
    %205 = arith.addf %204, %203 : vector<8x32xf32>
    %206 = math.tanh %205 : vector<8x32xf32>
    %cst_64 = arith.constant 1.000000e+00 : f32
    %207 = vector.broadcast %cst_64 : f32 to vector<8x32xf32>
    %208 = arith.subf %207, %200 : vector<8x32xf32>
    %209 = arith.mulf %208, %206 : vector<8x32xf32>
    %210 = arith.mulf %200, %125 : vector<8x32xf32>
    %211 = arith.addf %209, %210 : vector<8x32xf32>
    %212 = vector.broadcast %126 : i32 to vector<8x1xi32>
    %213 = arith.cmpi sgt, %22, %212 : vector<8x1xi32>
    %cst_65 = arith.constant 0.000000e+00 : f32
    %214 = vector.shape_cast %213 : vector<8x1xi1> to vector<8x1xi1>
    %215 = vector.broadcast %214 : vector<8x1xi1> to vector<8x32xi1>
    %216 = vector.broadcast %cst_65 : f32 to vector<8x32xf32>
    %217 = arith.select %215, %211, %216 : vector<8x32xi1>, vector<8x32xf32>
    %218 = arith.index_cast %126 : i32 to index
    %c0_66 = arith.constant 0 : index
    %c32_67 = arith.constant 32 : index
    %219 = vector.load %arg12[%218, %c0_66, %c32_67] : memref<8x8x64xf32, #tpu.memory_space<vmem>>, vector<1x8x32xf32>
    %220 = vector.shape_cast %219 : vector<1x8x32xf32> to vector<8x32xf32>
    %221 = vector.shape_cast %217 : vector<8x32xf32> to vector<1x8x32xf32>
    tpu.vector_store %arg12[%218, %c0_66, %c32_67], %221 {strides = array<i32>} : memref<8x8x64xf32, #tpu.memory_space<vmem>>, vector<1x8x32xf32>,
    %222 = vector.shape_cast %213 : vector<8x1xi1> to vector<8x1xi1>
    %223 = vector.broadcast %222 : vector<8x1xi1> to vector<8x32xi1>
    %224 = arith.select %223, %211, %125 : vector<8x32xi1>, vector<8x32xf32>
    %c2_i32 = arith.constant 2 : i32
    %c7_i32_68 = arith.constant 7 : i32
    %225 = arith.subi %c7_i32_68, %c2_i32 : i32
    %226 = arith.index_cast %c2_i32 : i32 to index
    %c0_69 = arith.constant 0 : index
    %c0_70 = arith.constant 0 : index
    %227 = vector.load %arg14[%226, %c0_69, %c0_70] : memref<8x8x96xbf16, #tpu.memory_space<vmem>>, vector<1x8x96xbf16>
    %228 = vector.shape_cast %227 : vector<1x8x96xbf16> to vector<8x96xbf16>
    %229 = arith.truncf %175 : vector<8x32xf32> to vector<8x32xbf16>
    %cst_71 = arith.constant dense<0.000000e+00> : vector<8x96xf32>
    %230 = tpu.matmul %229, %18, %cst_71 {dimension_numbers = #tpu.dot_dimension_numbers<[1], [0], [0], [1], [0, 0, 1, 1], [], []>} : vector<8x32xbf16>, vector<32x96xbf16>, vector<8x96xf32> -> vector<8x96xf32>
    %231 = vector.broadcast %20 : vector<1x96xf32> to vector<8x96xf32>
    %232 = arith.addf %230, %231 : vector<8x96xf32>
    %233 = vector.extract_strided_slice %228 {offsets = [0, 0], sizes = [8, 32], strides = [1, 1]} : vector<8x96xbf16> to vector<8x32xbf16>
    %234 = vector.extract_strided_slice %232 {offsets = [0, 0], sizes = [8, 32], strides = [1, 1]} : vector<8x96xf32> to vector<8x32xf32>
    %235 = arith.extf %233 : vector<8x32xbf16> to vector<8x32xf32>
    %236 = arith.addf %235, %234 : vector<8x32xf32>
    %237 = arith.negf %236 : vector<8x32xf32>
    %238 = math.exp %237 : vector<8x32xf32>
    %cst_72 = arith.constant 1.000000e+00 : f32
    %239 = vector.broadcast %cst_72 : f32 to vector<8x32xf32>
    %240 = arith.addf %239, %238 : vector<8x32xf32>
    %241 = arith.divf %239, %240 : vector<8x32xf32>
    %242 = vector.extract_strided_slice %228 {offsets = [0, 32], sizes = [8, 32], strides = [1, 1]} : vector<8x96xbf16> to vector<8x32xbf16>
    %243 = vector.extract_strided_slice %232 {offsets = [0, 32], sizes = [8, 32], strides = [1, 1]} : vector<8x96xf32> to vector<8x32xf32>
    %244 = arith.extf %242 : vector<8x32xbf16> to vector<8x32xf32>
    %245 = arith.addf %244, %243 : vector<8x32xf32>
    %246 = arith.negf %245 : vector<8x32xf32>
    %247 = math.exp %246 : vector<8x32xf32>
    %cst_73 = arith.constant 1.000000e+00 : f32
    %248 = vector.broadcast %cst_73 : f32 to vector<8x32xf32>
    %249 = arith.addf %248, %247 : vector<8x32xf32>
    %250 = arith.divf %248, %249 : vector<8x32xf32>
    %251 = vector.extract_strided_slice %228 {offsets = [0, 64], sizes = [8, 32], strides = [1, 1]} : vector<8x96xbf16> to vector<8x32xbf16>
    %252 = vector.extract_strided_slice %232 {offsets = [0, 64], sizes = [8, 32], strides = [1, 1]} : vector<8x96xf32> to vector<8x32xf32>
    %253 = arith.mulf %241, %252 : vector<8x32xf32>
    %254 = arith.extf %251 : vector<8x32xbf16> to vector<8x32xf32>
    %255 = arith.addf %254, %253 : vector<8x32xf32>
    %256 = math.tanh %255 : vector<8x32xf32>
    %cst_74 = arith.constant 1.000000e+00 : f32
    %257 = vector.broadcast %cst_74 : f32 to vector<8x32xf32>
    %258 = arith.subf %257, %250 : vector<8x32xf32>
    %259 = arith.mulf %258, %256 : vector<8x32xf32>
    %260 = arith.mulf %250, %175 : vector<8x32xf32>
    %261 = arith.addf %259, %260 : vector<8x32xf32>
    %262 = vector.broadcast %c2_i32 : i32 to vector<8x1xi32>
    %263 = arith.cmpi sgt, %22, %262 : vector<8x1xi32>
    %cst_75 = arith.constant 0.000000e+00 : f32
    %264 = vector.shape_cast %263 : vector<8x1xi1> to vector<8x1xi1>
    %265 = vector.broadcast %264 : vector<8x1xi1> to vector<8x32xi1>
    %266 = vector.broadcast %cst_75 : f32 to vector<8x32xf32>
    %267 = arith.select %265, %261, %266 : vector<8x32xi1>, vector<8x32xf32>
    %268 = arith.index_cast %c2_i32 : i32 to index
    %c0_76 = arith.constant 0 : index
    %c0_77 = arith.constant 0 : index
    %269 = vector.load %arg12[%268, %c0_76, %c0_77] : memref<8x8x64xf32, #tpu.memory_space<vmem>>, vector<1x8x32xf32>
    %270 = vector.shape_cast %269 : vector<1x8x32xf32> to vector<8x32xf32>
    %271 = vector.shape_cast %267 : vector<8x32xf32> to vector<1x8x32xf32>
    tpu.vector_store %arg12[%268, %c0_76, %c0_77], %271 {strides = array<i32>} : memref<8x8x64xf32, #tpu.memory_space<vmem>>, vector<1x8x32xf32>,
    %272 = vector.shape_cast %263 : vector<8x1xi1> to vector<8x1xi1>
    %273 = vector.broadcast %272 : vector<8x1xi1> to vector<8x32xi1>
    %274 = arith.select %273, %261, %175 : vector<8x32xi1>, vector<8x32xf32>
    %275 = arith.index_cast %225 : i32 to index
    %c0_78 = arith.constant 0 : index
    %c0_79 = arith.constant 0 : index
    %276 = vector.load %arg15[%275, %c0_78, %c0_79] : memref<8x8x96xbf16, #tpu.memory_space<vmem>>, vector<1x8x96xbf16>
    %277 = vector.shape_cast %276 : vector<1x8x96xbf16> to vector<8x96xbf16>
    %278 = arith.truncf %224 : vector<8x32xf32> to vector<8x32xbf16>
    %cst_80 = arith.constant dense<0.000000e+00> : vector<8x96xf32>
    %279 = tpu.matmul %278, %19, %cst_80 {dimension_numbers = #tpu.dot_dimension_numbers<[1], [0], [0], [1], [0, 0, 1, 1], [], []>} : vector<8x32xbf16>, vector<32x96xbf16>, vector<8x96xf32> -> vector<8x96xf32>
    %280 = vector.broadcast %21 : vector<1x96xf32> to vector<8x96xf32>
    %281 = arith.addf %279, %280 : vector<8x96xf32>
    %282 = vector.extract_strided_slice %277 {offsets = [0, 0], sizes = [8, 32], strides = [1, 1]} : vector<8x96xbf16> to vector<8x32xbf16>
    %283 = vector.extract_strided_slice %281 {offsets = [0, 0], sizes = [8, 32], strides = [1, 1]} : vector<8x96xf32> to vector<8x32xf32>
    %284 = arith.extf %282 : vector<8x32xbf16> to vector<8x32xf32>
    %285 = arith.addf %284, %283 : vector<8x32xf32>
    %286 = arith.negf %285 : vector<8x32xf32>
    %287 = math.exp %286 : vector<8x32xf32>
    %cst_81 = arith.constant 1.000000e+00 : f32
    %288 = vector.broadcast %cst_81 : f32 to vector<8x32xf32>
    %289 = arith.addf %288, %287 : vector<8x32xf32>
    %290 = arith.divf %288, %289 : vector<8x32xf32>
    %291 = vector.extract_strided_slice %277 {offsets = [0, 32], sizes = [8, 32], strides = [1, 1]} : vector<8x96xbf16> to vector<8x32xbf16>
    %292 = vector.extract_strided_slice %281 {offsets = [0, 32], sizes = [8, 32], strides = [1, 1]} : vector<8x96xf32> to vector<8x32xf32>
    %293 = arith.extf %291 : vector<8x32xbf16> to vector<8x32xf32>
    %294 = arith.addf %293, %292 : vector<8x32xf32>
    %295 = arith.negf %294 : vector<8x32xf32>
    %296 = math.exp %295 : vector<8x32xf32>
    %cst_82 = arith.constant 1.000000e+00 : f32
    %297 = vector.broadcast %cst_82 : f32 to vector<8x32xf32>
    %298 = arith.addf %297, %296 : vector<8x32xf32>
    %299 = arith.divf %297, %298 : vector<8x32xf32>
    %300 = vector.extract_strided_slice %277 {offsets = [0, 64], sizes = [8, 32], strides = [1, 1]} : vector<8x96xbf16> to vector<8x32xbf16>
    %301 = vector.extract_strided_slice %281 {offsets = [0, 64], sizes = [8, 32], strides = [1, 1]} : vector<8x96xf32> to vector<8x32xf32>
    %302 = arith.mulf %290, %301 : vector<8x32xf32>
    %303 = arith.extf %300 : vector<8x32xbf16> to vector<8x32xf32>
    %304 = arith.addf %303, %302 : vector<8x32xf32>
    %305 = math.tanh %304 : vector<8x32xf32>
    %cst_83 = arith.constant 1.000000e+00 : f32
    %306 = vector.broadcast %cst_83 : f32 to vector<8x32xf32>
    %307 = arith.subf %306, %299 : vector<8x32xf32>
    %308 = arith.mulf %307, %305 : vector<8x32xf32>
    %309 = arith.mulf %299, %224 : vector<8x32xf32>
    %310 = arith.addf %308, %309 : vector<8x32xf32>
    %311 = vector.broadcast %225 : i32 to vector<8x1xi32>
    %312 = arith.cmpi sgt, %22, %311 : vector<8x1xi32>
    %cst_84 = arith.constant 0.000000e+00 : f32
    %313 = vector.shape_cast %312 : vector<8x1xi1> to vector<8x1xi1>
    %314 = vector.broadcast %313 : vector<8x1xi1> to vector<8x32xi1>
    %315 = vector.broadcast %cst_84 : f32 to vector<8x32xf32>
    %316 = arith.select %314, %310, %315 : vector<8x32xi1>, vector<8x32xf32>
    %317 = arith.index_cast %225 : i32 to index
    %c0_85 = arith.constant 0 : index
    %c32_86 = arith.constant 32 : index
    %318 = vector.load %arg12[%317, %c0_85, %c32_86] : memref<8x8x64xf32, #tpu.memory_space<vmem>>, vector<1x8x32xf32>
    %319 = vector.shape_cast %318 : vector<1x8x32xf32> to vector<8x32xf32>
    %320 = vector.shape_cast %316 : vector<8x32xf32> to vector<1x8x32xf32>
    tpu.vector_store %arg12[%317, %c0_85, %c32_86], %320 {strides = array<i32>} : memref<8x8x64xf32, #tpu.memory_space<vmem>>, vector<1x8x32xf32>,
    %321 = vector.shape_cast %312 : vector<8x1xi1> to vector<8x1xi1>
    %322 = vector.broadcast %321 : vector<8x1xi1> to vector<8x32xi1>
    %323 = arith.select %322, %310, %224 : vector<8x32xi1>, vector<8x32xf32>
    %c3_i32 = arith.constant 3 : i32
    %c7_i32_87 = arith.constant 7 : i32
    %324 = arith.subi %c7_i32_87, %c3_i32 : i32
    %325 = arith.index_cast %c3_i32 : i32 to index
    %c0_88 = arith.constant 0 : index
    %c0_89 = arith.constant 0 : index
    %326 = vector.load %arg14[%325, %c0_88, %c0_89] : memref<8x8x96xbf16, #tpu.memory_space<vmem>>, vector<1x8x96xbf16>
    %327 = vector.shape_cast %326 : vector<1x8x96xbf16> to vector<8x96xbf16>
    %328 = arith.truncf %274 : vector<8x32xf32> to vector<8x32xbf16>
    %cst_90 = arith.constant dense<0.000000e+00> : vector<8x96xf32>
    %329 = tpu.matmul %328, %18, %cst_90 {dimension_numbers = #tpu.dot_dimension_numbers<[1], [0], [0], [1], [0, 0, 1, 1], [], []>} : vector<8x32xbf16>, vector<32x96xbf16>, vector<8x96xf32> -> vector<8x96xf32>
    %330 = vector.broadcast %20 : vector<1x96xf32> to vector<8x96xf32>
    %331 = arith.addf %329, %330 : vector<8x96xf32>
    %332 = vector.extract_strided_slice %327 {offsets = [0, 0], sizes = [8, 32], strides = [1, 1]} : vector<8x96xbf16> to vector<8x32xbf16>
    %333 = vector.extract_strided_slice %331 {offsets = [0, 0], sizes = [8, 32], strides = [1, 1]} : vector<8x96xf32> to vector<8x32xf32>
    %334 = arith.extf %332 : vector<8x32xbf16> to vector<8x32xf32>
    %335 = arith.addf %334, %333 : vector<8x32xf32>
    %336 = arith.negf %335 : vector<8x32xf32>
    %337 = math.exp %336 : vector<8x32xf32>
    %cst_91 = arith.constant 1.000000e+00 : f32
    %338 = vector.broadcast %cst_91 : f32 to vector<8x32xf32>
    %339 = arith.addf %338, %337 : vector<8x32xf32>
    %340 = arith.divf %338, %339 : vector<8x32xf32>
    %341 = vector.extract_strided_slice %327 {offsets = [0, 32], sizes = [8, 32], strides = [1, 1]} : vector<8x96xbf16> to vector<8x32xbf16>
    %342 = vector.extract_strided_slice %331 {offsets = [0, 32], sizes = [8, 32], strides = [1, 1]} : vector<8x96xf32> to vector<8x32xf32>
    %343 = arith.extf %341 : vector<8x32xbf16> to vector<8x32xf32>
    %344 = arith.addf %343, %342 : vector<8x32xf32>
    %345 = arith.negf %344 : vector<8x32xf32>
    %346 = math.exp %345 : vector<8x32xf32>
    %cst_92 = arith.constant 1.000000e+00 : f32
    %347 = vector.broadcast %cst_92 : f32 to vector<8x32xf32>
    %348 = arith.addf %347, %346 : vector<8x32xf32>
    %349 = arith.divf %347, %348 : vector<8x32xf32>
    %350 = vector.extract_strided_slice %327 {offsets = [0, 64], sizes = [8, 32], strides = [1, 1]} : vector<8x96xbf16> to vector<8x32xbf16>
    %351 = vector.extract_strided_slice %331 {offsets = [0, 64], sizes = [8, 32], strides = [1, 1]} : vector<8x96xf32> to vector<8x32xf32>
    %352 = arith.mulf %340, %351 : vector<8x32xf32>
    %353 = arith.extf %350 : vector<8x32xbf16> to vector<8x32xf32>
    %354 = arith.addf %353, %352 : vector<8x32xf32>
    %355 = math.tanh %354 : vector<8x32xf32>
    %cst_93 = arith.constant 1.000000e+00 : f32
    %356 = vector.broadcast %cst_93 : f32 to vector<8x32xf32>
    %357 = arith.subf %356, %349 : vector<8x32xf32>
    %358 = arith.mulf %357, %355 : vector<8x32xf32>
    %359 = arith.mulf %349, %274 : vector<8x32xf32>
    %360 = arith.addf %358, %359 : vector<8x32xf32>
    %361 = vector.broadcast %c3_i32 : i32 to vector<8x1xi32>
    %362 = arith.cmpi sgt, %22, %361 : vector<8x1xi32>
    %cst_94 = arith.constant 0.000000e+00 : f32
    %363 = vector.shape_cast %362 : vector<8x1xi1> to vector<8x1xi1>
    %364 = vector.broadcast %363 : vector<8x1xi1> to vector<8x32xi1>
    %365 = vector.broadcast %cst_94 : f32 to vector<8x32xf32>
    %366 = arith.select %364, %360, %365 : vector<8x32xi1>, vector<8x32xf32>
    %367 = arith.index_cast %c3_i32 : i32 to index
    %c0_95 = arith.constant 0 : index
    %c0_96 = arith.constant 0 : index
    %368 = vector.load %arg12[%367, %c0_95, %c0_96] : memref<8x8x64xf32, #tpu.memory_space<vmem>>, vector<1x8x32xf32>
    %369 = vector.shape_cast %368 : vector<1x8x32xf32> to vector<8x32xf32>
    %370 = vector.shape_cast %366 : vector<8x32xf32> to vector<1x8x32xf32>
    tpu.vector_store %arg12[%367, %c0_95, %c0_96], %370 {strides = array<i32>} : memref<8x8x64xf32, #tpu.memory_space<vmem>>, vector<1x8x32xf32>,
    %371 = vector.shape_cast %362 : vector<8x1xi1> to vector<8x1xi1>
    %372 = vector.broadcast %371 : vector<8x1xi1> to vector<8x32xi1>
    %373 = arith.select %372, %360, %274 : vector<8x32xi1>, vector<8x32xf32>
    %374 = arith.index_cast %324 : i32 to index
    %c0_97 = arith.constant 0 : index
    %c0_98 = arith.constant 0 : index
    %375 = vector.load %arg15[%374, %c0_97, %c0_98] : memref<8x8x96xbf16, #tpu.memory_space<vmem>>, vector<1x8x96xbf16>
    %376 = vector.shape_cast %375 : vector<1x8x96xbf16> to vector<8x96xbf16>
    %377 = arith.truncf %323 : vector<8x32xf32> to vector<8x32xbf16>
    %cst_99 = arith.constant dense<0.000000e+00> : vector<8x96xf32>
    %378 = tpu.matmul %377, %19, %cst_99 {dimension_numbers = #tpu.dot_dimension_numbers<[1], [0], [0], [1], [0, 0, 1, 1], [], []>} : vector<8x32xbf16>, vector<32x96xbf16>, vector<8x96xf32> -> vector<8x96xf32>
    %379 = vector.broadcast %21 : vector<1x96xf32> to vector<8x96xf32>
    %380 = arith.addf %378, %379 : vector<8x96xf32>
    %381 = vector.extract_strided_slice %376 {offsets = [0, 0], sizes = [8, 32], strides = [1, 1]} : vector<8x96xbf16> to vector<8x32xbf16>
    %382 = vector.extract_strided_slice %380 {offsets = [0, 0], sizes = [8, 32], strides = [1, 1]} : vector<8x96xf32> to vector<8x32xf32>
    %383 = arith.extf %381 : vector<8x32xbf16> to vector<8x32xf32>
    %384 = arith.addf %383, %382 : vector<8x32xf32>
    %385 = arith.negf %384 : vector<8x32xf32>
    %386 = math.exp %385 : vector<8x32xf32>
    %cst_100 = arith.constant 1.000000e+00 : f32
    %387 = vector.broadcast %cst_100 : f32 to vector<8x32xf32>
    %388 = arith.addf %387, %386 : vector<8x32xf32>
    %389 = arith.divf %387, %388 : vector<8x32xf32>
    %390 = vector.extract_strided_slice %376 {offsets = [0, 32], sizes = [8, 32], strides = [1, 1]} : vector<8x96xbf16> to vector<8x32xbf16>
    %391 = vector.extract_strided_slice %380 {offsets = [0, 32], sizes = [8, 32], strides = [1, 1]} : vector<8x96xf32> to vector<8x32xf32>
    %392 = arith.extf %390 : vector<8x32xbf16> to vector<8x32xf32>
    %393 = arith.addf %392, %391 : vector<8x32xf32>
    %394 = arith.negf %393 : vector<8x32xf32>
    %395 = math.exp %394 : vector<8x32xf32>
    %cst_101 = arith.constant 1.000000e+00 : f32
    %396 = vector.broadcast %cst_101 : f32 to vector<8x32xf32>
    %397 = arith.addf %396, %395 : vector<8x32xf32>
    %398 = arith.divf %396, %397 : vector<8x32xf32>
    %399 = vector.extract_strided_slice %376 {offsets = [0, 64], sizes = [8, 32], strides = [1, 1]} : vector<8x96xbf16> to vector<8x32xbf16>
    %400 = vector.extract_strided_slice %380 {offsets = [0, 64], sizes = [8, 32], strides = [1, 1]} : vector<8x96xf32> to vector<8x32xf32>
    %401 = arith.mulf %389, %400 : vector<8x32xf32>
    %402 = arith.extf %399 : vector<8x32xbf16> to vector<8x32xf32>
    %403 = arith.addf %402, %401 : vector<8x32xf32>
    %404 = math.tanh %403 : vector<8x32xf32>
    %cst_102 = arith.constant 1.000000e+00 : f32
    %405 = vector.broadcast %cst_102 : f32 to vector<8x32xf32>
    %406 = arith.subf %405, %398 : vector<8x32xf32>
    %407 = arith.mulf %406, %404 : vector<8x32xf32>
    %408 = arith.mulf %398, %323 : vector<8x32xf32>
    %409 = arith.addf %407, %408 : vector<8x32xf32>
    %410 = vector.broadcast %324 : i32 to vector<8x1xi32>
    %411 = arith.cmpi sgt, %22, %410 : vector<8x1xi32>
    %cst_103 = arith.constant 0.000000e+00 : f32
    %412 = vector.shape_cast %411 : vector<8x1xi1> to vector<8x1xi1>
    %413 = vector.broadcast %412 : vector<8x1xi1> to vector<8x32xi1>
    %414 = vector.broadcast %cst_103 : f32 to vector<8x32xf32>
    %415 = arith.select %413, %409, %414 : vector<8x32xi1>, vector<8x32xf32>
    %416 = arith.index_cast %324 : i32 to index
    %c0_104 = arith.constant 0 : index
    %c32_105 = arith.constant 32 : index
    %417 = vector.load %arg12[%416, %c0_104, %c32_105] : memref<8x8x64xf32, #tpu.memory_space<vmem>>, vector<1x8x32xf32>
    %418 = vector.shape_cast %417 : vector<1x8x32xf32> to vector<8x32xf32>
    %419 = vector.shape_cast %415 : vector<8x32xf32> to vector<1x8x32xf32>
    tpu.vector_store %arg12[%416, %c0_104, %c32_105], %419 {strides = array<i32>} : memref<8x8x64xf32, #tpu.memory_space<vmem>>, vector<1x8x32xf32>,
    %420 = vector.shape_cast %411 : vector<8x1xi1> to vector<8x1xi1>
    %421 = vector.broadcast %420 : vector<8x1xi1> to vector<8x32xi1>
    %422 = arith.select %421, %409, %323 : vector<8x32xi1>, vector<8x32xf32>
    %c4_i32 = arith.constant 4 : i32
    %c7_i32_106 = arith.constant 7 : i32
    %423 = arith.subi %c7_i32_106, %c4_i32 : i32
    %424 = arith.index_cast %c4_i32 : i32 to index
    %c0_107 = arith.constant 0 : index
    %c0_108 = arith.constant 0 : index
    %425 = vector.load %arg14[%424, %c0_107, %c0_108] : memref<8x8x96xbf16, #tpu.memory_space<vmem>>, vector<1x8x96xbf16>
    %426 = vector.shape_cast %425 : vector<1x8x96xbf16> to vector<8x96xbf16>
    %427 = arith.truncf %373 : vector<8x32xf32> to vector<8x32xbf16>
    %cst_109 = arith.constant dense<0.000000e+00> : vector<8x96xf32>
    %428 = tpu.matmul %427, %18, %cst_109 {dimension_numbers = #tpu.dot_dimension_numbers<[1], [0], [0], [1], [0, 0, 1, 1], [], []>} : vector<8x32xbf16>, vector<32x96xbf16>, vector<8x96xf32> -> vector<8x96xf32>
    %429 = vector.broadcast %20 : vector<1x96xf32> to vector<8x96xf32>
    %430 = arith.addf %428, %429 : vector<8x96xf32>
    %431 = vector.extract_strided_slice %426 {offsets = [0, 0], sizes = [8, 32], strides = [1, 1]} : vector<8x96xbf16> to vector<8x32xbf16>
    %432 = vector.extract_strided_slice %430 {offsets = [0, 0], sizes = [8, 32], strides = [1, 1]} : vector<8x96xf32> to vector<8x32xf32>
    %433 = arith.extf %431 : vector<8x32xbf16> to vector<8x32xf32>
    %434 = arith.addf %433, %432 : vector<8x32xf32>
    %435 = arith.negf %434 : vector<8x32xf32>
    %436 = math.exp %435 : vector<8x32xf32>
    %cst_110 = arith.constant 1.000000e+00 : f32
    %437 = vector.broadcast %cst_110 : f32 to vector<8x32xf32>
    %438 = arith.addf %437, %436 : vector<8x32xf32>
    %439 = arith.divf %437, %438 : vector<8x32xf32>
    %440 = vector.extract_strided_slice %426 {offsets = [0, 32], sizes = [8, 32], strides = [1, 1]} : vector<8x96xbf16> to vector<8x32xbf16>
    %441 = vector.extract_strided_slice %430 {offsets = [0, 32], sizes = [8, 32], strides = [1, 1]} : vector<8x96xf32> to vector<8x32xf32>
    %442 = arith.extf %440 : vector<8x32xbf16> to vector<8x32xf32>
    %443 = arith.addf %442, %441 : vector<8x32xf32>
    %444 = arith.negf %443 : vector<8x32xf32>
    %445 = math.exp %444 : vector<8x32xf32>
    %cst_111 = arith.constant 1.000000e+00 : f32
    %446 = vector.broadcast %cst_111 : f32 to vector<8x32xf32>
    %447 = arith.addf %446, %445 : vector<8x32xf32>
    %448 = arith.divf %446, %447 : vector<8x32xf32>
    %449 = vector.extract_strided_slice %426 {offsets = [0, 64], sizes = [8, 32], strides = [1, 1]} : vector<8x96xbf16> to vector<8x32xbf16>
    %450 = vector.extract_strided_slice %430 {offsets = [0, 64], sizes = [8, 32], strides = [1, 1]} : vector<8x96xf32> to vector<8x32xf32>
    %451 = arith.mulf %439, %450 : vector<8x32xf32>
    %452 = arith.extf %449 : vector<8x32xbf16> to vector<8x32xf32>
    %453 = arith.addf %452, %451 : vector<8x32xf32>
    %454 = math.tanh %453 : vector<8x32xf32>
    %cst_112 = arith.constant 1.000000e+00 : f32
    %455 = vector.broadcast %cst_112 : f32 to vector<8x32xf32>
    %456 = arith.subf %455, %448 : vector<8x32xf32>
    %457 = arith.mulf %456, %454 : vector<8x32xf32>
    %458 = arith.mulf %448, %373 : vector<8x32xf32>
    %459 = arith.addf %457, %458 : vector<8x32xf32>
    %460 = vector.broadcast %c4_i32 : i32 to vector<8x1xi32>
    %461 = arith.cmpi sgt, %22, %460 : vector<8x1xi32>
    %cst_113 = arith.constant 0.000000e+00 : f32
    %462 = vector.shape_cast %461 : vector<8x1xi1> to vector<8x1xi1>
    %463 = vector.broadcast %462 : vector<8x1xi1> to vector<8x32xi1>
    %464 = vector.broadcast %cst_113 : f32 to vector<8x32xf32>
    %465 = arith.select %463, %459, %464 : vector<8x32xi1>, vector<8x32xf32>
    %466 = arith.index_cast %c4_i32 : i32 to index
    %c0_114 = arith.constant 0 : index
    %c0_115 = arith.constant 0 : index
    %467 = vector.load %arg12[%466, %c0_114, %c0_115] : memref<8x8x64xf32, #tpu.memory_space<vmem>>, vector<1x8x32xf32>
    %468 = vector.shape_cast %467 : vector<1x8x32xf32> to vector<8x32xf32>
    %469 = vector.shape_cast %465 : vector<8x32xf32> to vector<1x8x32xf32>
    tpu.vector_store %arg12[%466, %c0_114, %c0_115], %469 {strides = array<i32>} : memref<8x8x64xf32, #tpu.memory_space<vmem>>, vector<1x8x32xf32>,
    %470 = vector.shape_cast %461 : vector<8x1xi1> to vector<8x1xi1>
    %471 = vector.broadcast %470 : vector<8x1xi1> to vector<8x32xi1>
    %472 = arith.select %471, %459, %373 : vector<8x32xi1>, vector<8x32xf32>
    %473 = arith.index_cast %423 : i32 to index
    %c0_116 = arith.constant 0 : index
    %c0_117 = arith.constant 0 : index
    %474 = vector.load %arg15[%473, %c0_116, %c0_117] : memref<8x8x96xbf16, #tpu.memory_space<vmem>>, vector<1x8x96xbf16>
    %475 = vector.shape_cast %474 : vector<1x8x96xbf16> to vector<8x96xbf16>
    %476 = arith.truncf %422 : vector<8x32xf32> to vector<8x32xbf16>
    %cst_118 = arith.constant dense<0.000000e+00> : vector<8x96xf32>
    %477 = tpu.matmul %476, %19, %cst_118 {dimension_numbers = #tpu.dot_dimension_numbers<[1], [0], [0], [1], [0, 0, 1, 1], [], []>} : vector<8x32xbf16>, vector<32x96xbf16>, vector<8x96xf32> -> vector<8x96xf32>
    %478 = vector.broadcast %21 : vector<1x96xf32> to vector<8x96xf32>
    %479 = arith.addf %477, %478 : vector<8x96xf32>
    %480 = vector.extract_strided_slice %475 {offsets = [0, 0], sizes = [8, 32], strides = [1, 1]} : vector<8x96xbf16> to vector<8x32xbf16>
    %481 = vector.extract_strided_slice %479 {offsets = [0, 0], sizes = [8, 32], strides = [1, 1]} : vector<8x96xf32> to vector<8x32xf32>
    %482 = arith.extf %480 : vector<8x32xbf16> to vector<8x32xf32>
    %483 = arith.addf %482, %481 : vector<8x32xf32>
    %484 = arith.negf %483 : vector<8x32xf32>
    %485 = math.exp %484 : vector<8x32xf32>
    %cst_119 = arith.constant 1.000000e+00 : f32
    %486 = vector.broadcast %cst_119 : f32 to vector<8x32xf32>
    %487 = arith.addf %486, %485 : vector<8x32xf32>
    %488 = arith.divf %486, %487 : vector<8x32xf32>
    %489 = vector.extract_strided_slice %475 {offsets = [0, 32], sizes = [8, 32], strides = [1, 1]} : vector<8x96xbf16> to vector<8x32xbf16>
    %490 = vector.extract_strided_slice %479 {offsets = [0, 32], sizes = [8, 32], strides = [1, 1]} : vector<8x96xf32> to vector<8x32xf32>
    %491 = arith.extf %489 : vector<8x32xbf16> to vector<8x32xf32>
    %492 = arith.addf %491, %490 : vector<8x32xf32>
    %493 = arith.negf %492 : vector<8x32xf32>
    %494 = math.exp %493 : vector<8x32xf32>
    %cst_120 = arith.constant 1.000000e+00 : f32
    %495 = vector.broadcast %cst_120 : f32 to vector<8x32xf32>
    %496 = arith.addf %495, %494 : vector<8x32xf32>
    %497 = arith.divf %495, %496 : vector<8x32xf32>
    %498 = vector.extract_strided_slice %475 {offsets = [0, 64], sizes = [8, 32], strides = [1, 1]} : vector<8x96xbf16> to vector<8x32xbf16>
    %499 = vector.extract_strided_slice %479 {offsets = [0, 64], sizes = [8, 32], strides = [1, 1]} : vector<8x96xf32> to vector<8x32xf32>
    %500 = arith.mulf %488, %499 : vector<8x32xf32>
    %501 = arith.extf %498 : vector<8x32xbf16> to vector<8x32xf32>
    %502 = arith.addf %501, %500 : vector<8x32xf32>
    %503 = math.tanh %502 : vector<8x32xf32>
    %cst_121 = arith.constant 1.000000e+00 : f32
    %504 = vector.broadcast %cst_121 : f32 to vector<8x32xf32>
    %505 = arith.subf %504, %497 : vector<8x32xf32>
    %506 = arith.mulf %505, %503 : vector<8x32xf32>
    %507 = arith.mulf %497, %422 : vector<8x32xf32>
    %508 = arith.addf %506, %507 : vector<8x32xf32>
    %509 = vector.broadcast %423 : i32 to vector<8x1xi32>
    %510 = arith.cmpi sgt, %22, %509 : vector<8x1xi32>
    %cst_122 = arith.constant 0.000000e+00 : f32
    %511 = vector.shape_cast %510 : vector<8x1xi1> to vector<8x1xi1>
    %512 = vector.broadcast %511 : vector<8x1xi1> to vector<8x32xi1>
    %513 = vector.broadcast %cst_122 : f32 to vector<8x32xf32>
    %514 = arith.select %512, %508, %513 : vector<8x32xi1>, vector<8x32xf32>
    %515 = arith.index_cast %423 : i32 to index
    %c0_123 = arith.constant 0 : index
    %c32_124 = arith.constant 32 : index
    %516 = vector.load %arg12[%515, %c0_123, %c32_124] : memref<8x8x64xf32, #tpu.memory_space<vmem>>, vector<1x8x32xf32>
    %517 = vector.shape_cast %516 : vector<1x8x32xf32> to vector<8x32xf32>
    %518 = vector.shape_cast %514 : vector<8x32xf32> to vector<1x8x32xf32>
    tpu.vector_store %arg12[%515, %c0_123, %c32_124], %518 {strides = array<i32>} : memref<8x8x64xf32, #tpu.memory_space<vmem>>, vector<1x8x32xf32>,
    %519 = vector.shape_cast %510 : vector<8x1xi1> to vector<8x1xi1>
    %520 = vector.broadcast %519 : vector<8x1xi1> to vector<8x32xi1>
    %521 = arith.select %520, %508, %422 : vector<8x32xi1>, vector<8x32xf32>
    %c5_i32 = arith.constant 5 : i32
    %c7_i32_125 = arith.constant 7 : i32
    %522 = arith.subi %c7_i32_125, %c5_i32 : i32
    %523 = arith.index_cast %c5_i32 : i32 to index
    %c0_126 = arith.constant 0 : index
    %c0_127 = arith.constant 0 : index
    %524 = vector.load %arg14[%523, %c0_126, %c0_127] : memref<8x8x96xbf16, #tpu.memory_space<vmem>>, vector<1x8x96xbf16>
    %525 = vector.shape_cast %524 : vector<1x8x96xbf16> to vector<8x96xbf16>
    %526 = arith.truncf %472 : vector<8x32xf32> to vector<8x32xbf16>
    %cst_128 = arith.constant dense<0.000000e+00> : vector<8x96xf32>
    %527 = tpu.matmul %526, %18, %cst_128 {dimension_numbers = #tpu.dot_dimension_numbers<[1], [0], [0], [1], [0, 0, 1, 1], [], []>} : vector<8x32xbf16>, vector<32x96xbf16>, vector<8x96xf32> -> vector<8x96xf32>
    %528 = vector.broadcast %20 : vector<1x96xf32> to vector<8x96xf32>
    %529 = arith.addf %527, %528 : vector<8x96xf32>
    %530 = vector.extract_strided_slice %525 {offsets = [0, 0], sizes = [8, 32], strides = [1, 1]} : vector<8x96xbf16> to vector<8x32xbf16>
    %531 = vector.extract_strided_slice %529 {offsets = [0, 0], sizes = [8, 32], strides = [1, 1]} : vector<8x96xf32> to vector<8x32xf32>
    %532 = arith.extf %530 : vector<8x32xbf16> to vector<8x32xf32>
    %533 = arith.addf %532, %531 : vector<8x32xf32>
    %534 = arith.negf %533 : vector<8x32xf32>
    %535 = math.exp %534 : vector<8x32xf32>
    %cst_129 = arith.constant 1.000000e+00 : f32
    %536 = vector.broadcast %cst_129 : f32 to vector<8x32xf32>
    %537 = arith.addf %536, %535 : vector<8x32xf32>
    %538 = arith.divf %536, %537 : vector<8x32xf32>
    %539 = vector.extract_strided_slice %525 {offsets = [0, 32], sizes = [8, 32], strides = [1, 1]} : vector<8x96xbf16> to vector<8x32xbf16>
    %540 = vector.extract_strided_slice %529 {offsets = [0, 32], sizes = [8, 32], strides = [1, 1]} : vector<8x96xf32> to vector<8x32xf32>
    %541 = arith.extf %539 : vector<8x32xbf16> to vector<8x32xf32>
    %542 = arith.addf %541, %540 : vector<8x32xf32>
    %543 = arith.negf %542 : vector<8x32xf32>
    %544 = math.exp %543 : vector<8x32xf32>
    %cst_130 = arith.constant 1.000000e+00 : f32
    %545 = vector.broadcast %cst_130 : f32 to vector<8x32xf32>
    %546 = arith.addf %545, %544 : vector<8x32xf32>
    %547 = arith.divf %545, %546 : vector<8x32xf32>
    %548 = vector.extract_strided_slice %525 {offsets = [0, 64], sizes = [8, 32], strides = [1, 1]} : vector<8x96xbf16> to vector<8x32xbf16>
    %549 = vector.extract_strided_slice %529 {offsets = [0, 64], sizes = [8, 32], strides = [1, 1]} : vector<8x96xf32> to vector<8x32xf32>
    %550 = arith.mulf %538, %549 : vector<8x32xf32>
    %551 = arith.extf %548 : vector<8x32xbf16> to vector<8x32xf32>
    %552 = arith.addf %551, %550 : vector<8x32xf32>
    %553 = math.tanh %552 : vector<8x32xf32>
    %cst_131 = arith.constant 1.000000e+00 : f32
    %554 = vector.broadcast %cst_131 : f32 to vector<8x32xf32>
    %555 = arith.subf %554, %547 : vector<8x32xf32>
    %556 = arith.mulf %555, %553 : vector<8x32xf32>
    %557 = arith.mulf %547, %472 : vector<8x32xf32>
    %558 = arith.addf %556, %557 : vector<8x32xf32>
    %559 = vector.broadcast %c5_i32 : i32 to vector<8x1xi32>
    %560 = arith.cmpi sgt, %22, %559 : vector<8x1xi32>
    %cst_132 = arith.constant 0.000000e+00 : f32
    %561 = vector.shape_cast %560 : vector<8x1xi1> to vector<8x1xi1>
    %562 = vector.broadcast %561 : vector<8x1xi1> to vector<8x32xi1>
    %563 = vector.broadcast %cst_132 : f32 to vector<8x32xf32>
    %564 = arith.select %562, %558, %563 : vector<8x32xi1>, vector<8x32xf32>
    %565 = arith.index_cast %c5_i32 : i32 to index
    %c0_133 = arith.constant 0 : index
    %c0_134 = arith.constant 0 : index
    %566 = vector.load %arg12[%565, %c0_133, %c0_134] : memref<8x8x64xf32, #tpu.memory_space<vmem>>, vector<1x8x32xf32>
    %567 = vector.shape_cast %566 : vector<1x8x32xf32> to vector<8x32xf32>
    %568 = vector.shape_cast %564 : vector<8x32xf32> to vector<1x8x32xf32>
    tpu.vector_store %arg12[%565, %c0_133, %c0_134], %568 {strides = array<i32>} : memref<8x8x64xf32, #tpu.memory_space<vmem>>, vector<1x8x32xf32>,
    %569 = vector.shape_cast %560 : vector<8x1xi1> to vector<8x1xi1>
    %570 = vector.broadcast %569 : vector<8x1xi1> to vector<8x32xi1>
    %571 = arith.select %570, %558, %472 : vector<8x32xi1>, vector<8x32xf32>
    %572 = arith.index_cast %522 : i32 to index
    %c0_135 = arith.constant 0 : index
    %c0_136 = arith.constant 0 : index
    %573 = vector.load %arg15[%572, %c0_135, %c0_136] : memref<8x8x96xbf16, #tpu.memory_space<vmem>>, vector<1x8x96xbf16>
    %574 = vector.shape_cast %573 : vector<1x8x96xbf16> to vector<8x96xbf16>
    %575 = arith.truncf %521 : vector<8x32xf32> to vector<8x32xbf16>
    %cst_137 = arith.constant dense<0.000000e+00> : vector<8x96xf32>
    %576 = tpu.matmul %575, %19, %cst_137 {dimension_numbers = #tpu.dot_dimension_numbers<[1], [0], [0], [1], [0, 0, 1, 1], [], []>} : vector<8x32xbf16>, vector<32x96xbf16>, vector<8x96xf32> -> vector<8x96xf32>
    %577 = vector.broadcast %21 : vector<1x96xf32> to vector<8x96xf32>
    %578 = arith.addf %576, %577 : vector<8x96xf32>
    %579 = vector.extract_strided_slice %574 {offsets = [0, 0], sizes = [8, 32], strides = [1, 1]} : vector<8x96xbf16> to vector<8x32xbf16>
    %580 = vector.extract_strided_slice %578 {offsets = [0, 0], sizes = [8, 32], strides = [1, 1]} : vector<8x96xf32> to vector<8x32xf32>
    %581 = arith.extf %579 : vector<8x32xbf16> to vector<8x32xf32>
    %582 = arith.addf %581, %580 : vector<8x32xf32>
    %583 = arith.negf %582 : vector<8x32xf32>
    %584 = math.exp %583 : vector<8x32xf32>
    %cst_138 = arith.constant 1.000000e+00 : f32
    %585 = vector.broadcast %cst_138 : f32 to vector<8x32xf32>
    %586 = arith.addf %585, %584 : vector<8x32xf32>
    %587 = arith.divf %585, %586 : vector<8x32xf32>
    %588 = vector.extract_strided_slice %574 {offsets = [0, 32], sizes = [8, 32], strides = [1, 1]} : vector<8x96xbf16> to vector<8x32xbf16>
    %589 = vector.extract_strided_slice %578 {offsets = [0, 32], sizes = [8, 32], strides = [1, 1]} : vector<8x96xf32> to vector<8x32xf32>
    %590 = arith.extf %588 : vector<8x32xbf16> to vector<8x32xf32>
    %591 = arith.addf %590, %589 : vector<8x32xf32>
    %592 = arith.negf %591 : vector<8x32xf32>
    %593 = math.exp %592 : vector<8x32xf32>
    %cst_139 = arith.constant 1.000000e+00 : f32
    %594 = vector.broadcast %cst_139 : f32 to vector<8x32xf32>
    %595 = arith.addf %594, %593 : vector<8x32xf32>
    %596 = arith.divf %594, %595 : vector<8x32xf32>
    %597 = vector.extract_strided_slice %574 {offsets = [0, 64], sizes = [8, 32], strides = [1, 1]} : vector<8x96xbf16> to vector<8x32xbf16>
    %598 = vector.extract_strided_slice %578 {offsets = [0, 64], sizes = [8, 32], strides = [1, 1]} : vector<8x96xf32> to vector<8x32xf32>
    %599 = arith.mulf %587, %598 : vector<8x32xf32>
    %600 = arith.extf %597 : vector<8x32xbf16> to vector<8x32xf32>
    %601 = arith.addf %600, %599 : vector<8x32xf32>
    %602 = math.tanh %601 : vector<8x32xf32>
    %cst_140 = arith.constant 1.000000e+00 : f32
    %603 = vector.broadcast %cst_140 : f32 to vector<8x32xf32>
    %604 = arith.subf %603, %596 : vector<8x32xf32>
    %605 = arith.mulf %604, %602 : vector<8x32xf32>
    %606 = arith.mulf %596, %521 : vector<8x32xf32>
    %607 = arith.addf %605, %606 : vector<8x32xf32>
    %608 = vector.broadcast %522 : i32 to vector<8x1xi32>
    %609 = arith.cmpi sgt, %22, %608 : vector<8x1xi32>
    %cst_141 = arith.constant 0.000000e+00 : f32
    %610 = vector.shape_cast %609 : vector<8x1xi1> to vector<8x1xi1>
    %611 = vector.broadcast %610 : vector<8x1xi1> to vector<8x32xi1>
    %612 = vector.broadcast %cst_141 : f32 to vector<8x32xf32>
    %613 = arith.select %611, %607, %612 : vector<8x32xi1>, vector<8x32xf32>
    %614 = arith.index_cast %522 : i32 to index
    %c0_142 = arith.constant 0 : index
    %c32_143 = arith.constant 32 : index
    %615 = vector.load %arg12[%614, %c0_142, %c32_143] : memref<8x8x64xf32, #tpu.memory_space<vmem>>, vector<1x8x32xf32>
    %616 = vector.shape_cast %615 : vector<1x8x32xf32> to vector<8x32xf32>
    %617 = vector.shape_cast %613 : vector<8x32xf32> to vector<1x8x32xf32>
    tpu.vector_store %arg12[%614, %c0_142, %c32_143], %617 {strides = array<i32>} : memref<8x8x64xf32, #tpu.memory_space<vmem>>, vector<1x8x32xf32>,
    %618 = vector.shape_cast %609 : vector<8x1xi1> to vector<8x1xi1>
    %619 = vector.broadcast %618 : vector<8x1xi1> to vector<8x32xi1>
    %620 = arith.select %619, %607, %521 : vector<8x32xi1>, vector<8x32xf32>
    %c6_i32 = arith.constant 6 : i32
    %c7_i32_144 = arith.constant 7 : i32
    %621 = arith.subi %c7_i32_144, %c6_i32 : i32
    %622 = arith.index_cast %c6_i32 : i32 to index
    %c0_145 = arith.constant 0 : index
    %c0_146 = arith.constant 0 : index
    %623 = vector.load %arg14[%622, %c0_145, %c0_146] : memref<8x8x96xbf16, #tpu.memory_space<vmem>>, vector<1x8x96xbf16>
    %624 = vector.shape_cast %623 : vector<1x8x96xbf16> to vector<8x96xbf16>
    %625 = arith.truncf %571 : vector<8x32xf32> to vector<8x32xbf16>
    %cst_147 = arith.constant dense<0.000000e+00> : vector<8x96xf32>
    %626 = tpu.matmul %625, %18, %cst_147 {dimension_numbers = #tpu.dot_dimension_numbers<[1], [0], [0], [1], [0, 0, 1, 1], [], []>} : vector<8x32xbf16>, vector<32x96xbf16>, vector<8x96xf32> -> vector<8x96xf32>
    %627 = vector.broadcast %20 : vector<1x96xf32> to vector<8x96xf32>
    %628 = arith.addf %626, %627 : vector<8x96xf32>
    %629 = vector.extract_strided_slice %624 {offsets = [0, 0], sizes = [8, 32], strides = [1, 1]} : vector<8x96xbf16> to vector<8x32xbf16>
    %630 = vector.extract_strided_slice %628 {offsets = [0, 0], sizes = [8, 32], strides = [1, 1]} : vector<8x96xf32> to vector<8x32xf32>
    %631 = arith.extf %629 : vector<8x32xbf16> to vector<8x32xf32>
    %632 = arith.addf %631, %630 : vector<8x32xf32>
    %633 = arith.negf %632 : vector<8x32xf32>
    %634 = math.exp %633 : vector<8x32xf32>
    %cst_148 = arith.constant 1.000000e+00 : f32
    %635 = vector.broadcast %cst_148 : f32 to vector<8x32xf32>
    %636 = arith.addf %635, %634 : vector<8x32xf32>
    %637 = arith.divf %635, %636 : vector<8x32xf32>
    %638 = vector.extract_strided_slice %624 {offsets = [0, 32], sizes = [8, 32], strides = [1, 1]} : vector<8x96xbf16> to vector<8x32xbf16>
    %639 = vector.extract_strided_slice %628 {offsets = [0, 32], sizes = [8, 32], strides = [1, 1]} : vector<8x96xf32> to vector<8x32xf32>
    %640 = arith.extf %638 : vector<8x32xbf16> to vector<8x32xf32>
    %641 = arith.addf %640, %639 : vector<8x32xf32>
    %642 = arith.negf %641 : vector<8x32xf32>
    %643 = math.exp %642 : vector<8x32xf32>
    %cst_149 = arith.constant 1.000000e+00 : f32
    %644 = vector.broadcast %cst_149 : f32 to vector<8x32xf32>
    %645 = arith.addf %644, %643 : vector<8x32xf32>
    %646 = arith.divf %644, %645 : vector<8x32xf32>
    %647 = vector.extract_strided_slice %624 {offsets = [0, 64], sizes = [8, 32], strides = [1, 1]} : vector<8x96xbf16> to vector<8x32xbf16>
    %648 = vector.extract_strided_slice %628 {offsets = [0, 64], sizes = [8, 32], strides = [1, 1]} : vector<8x96xf32> to vector<8x32xf32>
    %649 = arith.mulf %637, %648 : vector<8x32xf32>
    %650 = arith.extf %647 : vector<8x32xbf16> to vector<8x32xf32>
    %651 = arith.addf %650, %649 : vector<8x32xf32>
    %652 = math.tanh %651 : vector<8x32xf32>
    %cst_150 = arith.constant 1.000000e+00 : f32
    %653 = vector.broadcast %cst_150 : f32 to vector<8x32xf32>
    %654 = arith.subf %653, %646 : vector<8x32xf32>
    %655 = arith.mulf %654, %652 : vector<8x32xf32>
    %656 = arith.mulf %646, %571 : vector<8x32xf32>
    %657 = arith.addf %655, %656 : vector<8x32xf32>
    %658 = vector.broadcast %c6_i32 : i32 to vector<8x1xi32>
    %659 = arith.cmpi sgt, %22, %658 : vector<8x1xi32>
    %cst_151 = arith.constant 0.000000e+00 : f32
    %660 = vector.shape_cast %659 : vector<8x1xi1> to vector<8x1xi1>
    %661 = vector.broadcast %660 : vector<8x1xi1> to vector<8x32xi1>
    %662 = vector.broadcast %cst_151 : f32 to vector<8x32xf32>
    %663 = arith.select %661, %657, %662 : vector<8x32xi1>, vector<8x32xf32>
    %664 = arith.index_cast %c6_i32 : i32 to index
    %c0_152 = arith.constant 0 : index
    %c0_153 = arith.constant 0 : index
    %665 = vector.load %arg12[%664, %c0_152, %c0_153] : memref<8x8x64xf32, #tpu.memory_space<vmem>>, vector<1x8x32xf32>
    %666 = vector.shape_cast %665 : vector<1x8x32xf32> to vector<8x32xf32>
    %667 = vector.shape_cast %663 : vector<8x32xf32> to vector<1x8x32xf32>
    tpu.vector_store %arg12[%664, %c0_152, %c0_153], %667 {strides = array<i32>} : memref<8x8x64xf32, #tpu.memory_space<vmem>>, vector<1x8x32xf32>,
    %668 = vector.shape_cast %659 : vector<8x1xi1> to vector<8x1xi1>
    %669 = vector.broadcast %668 : vector<8x1xi1> to vector<8x32xi1>
    %670 = arith.select %669, %657, %571 : vector<8x32xi1>, vector<8x32xf32>
    %671 = arith.index_cast %621 : i32 to index
    %c0_154 = arith.constant 0 : index
    %c0_155 = arith.constant 0 : index
    %672 = vector.load %arg15[%671, %c0_154, %c0_155] : memref<8x8x96xbf16, #tpu.memory_space<vmem>>, vector<1x8x96xbf16>
    %673 = vector.shape_cast %672 : vector<1x8x96xbf16> to vector<8x96xbf16>
    %674 = arith.truncf %620 : vector<8x32xf32> to vector<8x32xbf16>
    %cst_156 = arith.constant dense<0.000000e+00> : vector<8x96xf32>
    %675 = tpu.matmul %674, %19, %cst_156 {dimension_numbers = #tpu.dot_dimension_numbers<[1], [0], [0], [1], [0, 0, 1, 1], [], []>} : vector<8x32xbf16>, vector<32x96xbf16>, vector<8x96xf32> -> vector<8x96xf32>
    %676 = vector.broadcast %21 : vector<1x96xf32> to vector<8x96xf32>
    %677 = arith.addf %675, %676 : vector<8x96xf32>
    %678 = vector.extract_strided_slice %673 {offsets = [0, 0], sizes = [8, 32], strides = [1, 1]} : vector<8x96xbf16> to vector<8x32xbf16>
    %679 = vector.extract_strided_slice %677 {offsets = [0, 0], sizes = [8, 32], strides = [1, 1]} : vector<8x96xf32> to vector<8x32xf32>
    %680 = arith.extf %678 : vector<8x32xbf16> to vector<8x32xf32>
    %681 = arith.addf %680, %679 : vector<8x32xf32>
    %682 = arith.negf %681 : vector<8x32xf32>
    %683 = math.exp %682 : vector<8x32xf32>
    %cst_157 = arith.constant 1.000000e+00 : f32
    %684 = vector.broadcast %cst_157 : f32 to vector<8x32xf32>
    %685 = arith.addf %684, %683 : vector<8x32xf32>
    %686 = arith.divf %684, %685 : vector<8x32xf32>
    %687 = vector.extract_strided_slice %673 {offsets = [0, 32], sizes = [8, 32], strides = [1, 1]} : vector<8x96xbf16> to vector<8x32xbf16>
    %688 = vector.extract_strided_slice %677 {offsets = [0, 32], sizes = [8, 32], strides = [1, 1]} : vector<8x96xf32> to vector<8x32xf32>
    %689 = arith.extf %687 : vector<8x32xbf16> to vector<8x32xf32>
    %690 = arith.addf %689, %688 : vector<8x32xf32>
    %691 = arith.negf %690 : vector<8x32xf32>
    %692 = math.exp %691 : vector<8x32xf32>
    %cst_158 = arith.constant 1.000000e+00 : f32
    %693 = vector.broadcast %cst_158 : f32 to vector<8x32xf32>
    %694 = arith.addf %693, %692 : vector<8x32xf32>
    %695 = arith.divf %693, %694 : vector<8x32xf32>
    %696 = vector.extract_strided_slice %673 {offsets = [0, 64], sizes = [8, 32], strides = [1, 1]} : vector<8x96xbf16> to vector<8x32xbf16>
    %697 = vector.extract_strided_slice %677 {offsets = [0, 64], sizes = [8, 32], strides = [1, 1]} : vector<8x96xf32> to vector<8x32xf32>
    %698 = arith.mulf %686, %697 : vector<8x32xf32>
    %699 = arith.extf %696 : vector<8x32xbf16> to vector<8x32xf32>
    %700 = arith.addf %699, %698 : vector<8x32xf32>
    %701 = math.tanh %700 : vector<8x32xf32>
    %cst_159 = arith.constant 1.000000e+00 : f32
    %702 = vector.broadcast %cst_159 : f32 to vector<8x32xf32>
    %703 = arith.subf %702, %695 : vector<8x32xf32>
    %704 = arith.mulf %703, %701 : vector<8x32xf32>
    %705 = arith.mulf %695, %620 : vector<8x32xf32>
    %706 = arith.addf %704, %705 : vector<8x32xf32>
    %707 = vector.broadcast %621 : i32 to vector<8x1xi32>
    %708 = arith.cmpi sgt, %22, %707 : vector<8x1xi32>
    %cst_160 = arith.constant 0.000000e+00 : f32
    %709 = vector.shape_cast %708 : vector<8x1xi1> to vector<8x1xi1>
    %710 = vector.broadcast %709 : vector<8x1xi1> to vector<8x32xi1>
    %711 = vector.broadcast %cst_160 : f32 to vector<8x32xf32>
    %712 = arith.select %710, %706, %711 : vector<8x32xi1>, vector<8x32xf32>
    %713 = arith.index_cast %621 : i32 to index
    %c0_161 = arith.constant 0 : index
    %c32_162 = arith.constant 32 : index
    %714 = vector.load %arg12[%713, %c0_161, %c32_162] : memref<8x8x64xf32, #tpu.memory_space<vmem>>, vector<1x8x32xf32>
    %715 = vector.shape_cast %714 : vector<1x8x32xf32> to vector<8x32xf32>
    %716 = vector.shape_cast %712 : vector<8x32xf32> to vector<1x8x32xf32>
    tpu.vector_store %arg12[%713, %c0_161, %c32_162], %716 {strides = array<i32>} : memref<8x8x64xf32, #tpu.memory_space<vmem>>, vector<1x8x32xf32>,
    %717 = vector.shape_cast %708 : vector<8x1xi1> to vector<8x1xi1>
    %718 = vector.broadcast %717 : vector<8x1xi1> to vector<8x32xi1>
    %719 = arith.select %718, %706, %620 : vector<8x32xi1>, vector<8x32xf32>
    %c7_i32_163 = arith.constant 7 : i32
    %c7_i32_164 = arith.constant 7 : i32
    %720 = arith.subi %c7_i32_164, %c7_i32_163 : i32
    %721 = arith.index_cast %c7_i32_163 : i32 to index
    %c0_165 = arith.constant 0 : index
    %c0_166 = arith.constant 0 : index
    %722 = vector.load %arg14[%721, %c0_165, %c0_166] : memref<8x8x96xbf16, #tpu.memory_space<vmem>>, vector<1x8x96xbf16>
    %723 = vector.shape_cast %722 : vector<1x8x96xbf16> to vector<8x96xbf16>
    %724 = arith.truncf %670 : vector<8x32xf32> to vector<8x32xbf16>
    %cst_167 = arith.constant dense<0.000000e+00> : vector<8x96xf32>
    %725 = tpu.matmul %724, %18, %cst_167 {dimension_numbers = #tpu.dot_dimension_numbers<[1], [0], [0], [1], [0, 0, 1, 1], [], []>} : vector<8x32xbf16>, vector<32x96xbf16>, vector<8x96xf32> -> vector<8x96xf32>
    %726 = vector.broadcast %20 : vector<1x96xf32> to vector<8x96xf32>
    %727 = arith.addf %725, %726 : vector<8x96xf32>
    %728 = vector.extract_strided_slice %723 {offsets = [0, 0], sizes = [8, 32], strides = [1, 1]} : vector<8x96xbf16> to vector<8x32xbf16>
    %729 = vector.extract_strided_slice %727 {offsets = [0, 0], sizes = [8, 32], strides = [1, 1]} : vector<8x96xf32> to vector<8x32xf32>
    %730 = arith.extf %728 : vector<8x32xbf16> to vector<8x32xf32>
    %731 = arith.addf %730, %729 : vector<8x32xf32>
    %732 = arith.negf %731 : vector<8x32xf32>
    %733 = math.exp %732 : vector<8x32xf32>
    %cst_168 = arith.constant 1.000000e+00 : f32
    %734 = vector.broadcast %cst_168 : f32 to vector<8x32xf32>
    %735 = arith.addf %734, %733 : vector<8x32xf32>
    %736 = arith.divf %734, %735 : vector<8x32xf32>
    %737 = vector.extract_strided_slice %723 {offsets = [0, 32], sizes = [8, 32], strides = [1, 1]} : vector<8x96xbf16> to vector<8x32xbf16>
    %738 = vector.extract_strided_slice %727 {offsets = [0, 32], sizes = [8, 32], strides = [1, 1]} : vector<8x96xf32> to vector<8x32xf32>
    %739 = arith.extf %737 : vector<8x32xbf16> to vector<8x32xf32>
    %740 = arith.addf %739, %738 : vector<8x32xf32>
    %741 = arith.negf %740 : vector<8x32xf32>
    %742 = math.exp %741 : vector<8x32xf32>
    %cst_169 = arith.constant 1.000000e+00 : f32
    %743 = vector.broadcast %cst_169 : f32 to vector<8x32xf32>
    %744 = arith.addf %743, %742 : vector<8x32xf32>
    %745 = arith.divf %743, %744 : vector<8x32xf32>
    %746 = vector.extract_strided_slice %723 {offsets = [0, 64], sizes = [8, 32], strides = [1, 1]} : vector<8x96xbf16> to vector<8x32xbf16>
    %747 = vector.extract_strided_slice %727 {offsets = [0, 64], sizes = [8, 32], strides = [1, 1]} : vector<8x96xf32> to vector<8x32xf32>
    %748 = arith.mulf %736, %747 : vector<8x32xf32>
    %749 = arith.extf %746 : vector<8x32xbf16> to vector<8x32xf32>
    %750 = arith.addf %749, %748 : vector<8x32xf32>
    %751 = math.tanh %750 : vector<8x32xf32>
    %cst_170 = arith.constant 1.000000e+00 : f32
    %752 = vector.broadcast %cst_170 : f32 to vector<8x32xf32>
    %753 = arith.subf %752, %745 : vector<8x32xf32>
    %754 = arith.mulf %753, %751 : vector<8x32xf32>
    %755 = arith.mulf %745, %670 : vector<8x32xf32>
    %756 = arith.addf %754, %755 : vector<8x32xf32>
    %757 = vector.broadcast %c7_i32_163 : i32 to vector<8x1xi32>
    %758 = arith.cmpi sgt, %22, %757 : vector<8x1xi32>
    %cst_171 = arith.constant 0.000000e+00 : f32
    %759 = vector.shape_cast %758 : vector<8x1xi1> to vector<8x1xi1>
    %760 = vector.broadcast %759 : vector<8x1xi1> to vector<8x32xi1>
    %761 = vector.broadcast %cst_171 : f32 to vector<8x32xf32>
    %762 = arith.select %760, %756, %761 : vector<8x32xi1>, vector<8x32xf32>
    %763 = arith.index_cast %c7_i32_163 : i32 to index
    %c0_172 = arith.constant 0 : index
    %c0_173 = arith.constant 0 : index
    %764 = vector.load %arg12[%763, %c0_172, %c0_173] : memref<8x8x64xf32, #tpu.memory_space<vmem>>, vector<1x8x32xf32>
    %765 = vector.shape_cast %764 : vector<1x8x32xf32> to vector<8x32xf32>
    %766 = vector.shape_cast %762 : vector<8x32xf32> to vector<1x8x32xf32>
    tpu.vector_store %arg12[%763, %c0_172, %c0_173], %766 {strides = array<i32>} : memref<8x8x64xf32, #tpu.memory_space<vmem>>, vector<1x8x32xf32>,
    %767 = vector.shape_cast %758 : vector<8x1xi1> to vector<8x1xi1>
    %768 = vector.broadcast %767 : vector<8x1xi1> to vector<8x32xi1>
    %769 = arith.select %768, %756, %670 : vector<8x32xi1>, vector<8x32xf32>
    %770 = arith.index_cast %720 : i32 to index
    %c0_174 = arith.constant 0 : index
    %c0_175 = arith.constant 0 : index
    %771 = vector.load %arg15[%770, %c0_174, %c0_175] : memref<8x8x96xbf16, #tpu.memory_space<vmem>>, vector<1x8x96xbf16>
    %772 = vector.shape_cast %771 : vector<1x8x96xbf16> to vector<8x96xbf16>
    %773 = arith.truncf %719 : vector<8x32xf32> to vector<8x32xbf16>
    %cst_176 = arith.constant dense<0.000000e+00> : vector<8x96xf32>
    %774 = tpu.matmul %773, %19, %cst_176 {dimension_numbers = #tpu.dot_dimension_numbers<[1], [0], [0], [1], [0, 0, 1, 1], [], []>} : vector<8x32xbf16>, vector<32x96xbf16>, vector<8x96xf32> -> vector<8x96xf32>
    %775 = vector.broadcast %21 : vector<1x96xf32> to vector<8x96xf32>
    %776 = arith.addf %774, %775 : vector<8x96xf32>
    %777 = vector.extract_strided_slice %772 {offsets = [0, 0], sizes = [8, 32], strides = [1, 1]} : vector<8x96xbf16> to vector<8x32xbf16>
    %778 = vector.extract_strided_slice %776 {offsets = [0, 0], sizes = [8, 32], strides = [1, 1]} : vector<8x96xf32> to vector<8x32xf32>
    %779 = arith.extf %777 : vector<8x32xbf16> to vector<8x32xf32>
    %780 = arith.addf %779, %778 : vector<8x32xf32>
    %781 = arith.negf %780 : vector<8x32xf32>
    %782 = math.exp %781 : vector<8x32xf32>
    %cst_177 = arith.constant 1.000000e+00 : f32
    %783 = vector.broadcast %cst_177 : f32 to vector<8x32xf32>
    %784 = arith.addf %783, %782 : vector<8x32xf32>
    %785 = arith.divf %783, %784 : vector<8x32xf32>
    %786 = vector.extract_strided_slice %772 {offsets = [0, 32], sizes = [8, 32], strides = [1, 1]} : vector<8x96xbf16> to vector<8x32xbf16>
    %787 = vector.extract_strided_slice %776 {offsets = [0, 32], sizes = [8, 32], strides = [1, 1]} : vector<8x96xf32> to vector<8x32xf32>
    %788 = arith.extf %786 : vector<8x32xbf16> to vector<8x32xf32>
    %789 = arith.addf %788, %787 : vector<8x32xf32>
    %790 = arith.negf %789 : vector<8x32xf32>
    %791 = math.exp %790 : vector<8x32xf32>
    %cst_178 = arith.constant 1.000000e+00 : f32
    %792 = vector.broadcast %cst_178 : f32 to vector<8x32xf32>
    %793 = arith.addf %792, %791 : vector<8x32xf32>
    %794 = arith.divf %792, %793 : vector<8x32xf32>
    %795 = vector.extract_strided_slice %772 {offsets = [0, 64], sizes = [8, 32], strides = [1, 1]} : vector<8x96xbf16> to vector<8x32xbf16>
    %796 = vector.extract_strided_slice %776 {offsets = [0, 64], sizes = [8, 32], strides = [1, 1]} : vector<8x96xf32> to vector<8x32xf32>
    %797 = arith.mulf %785, %796 : vector<8x32xf32>
    %798 = arith.extf %795 : vector<8x32xbf16> to vector<8x32xf32>
    %799 = arith.addf %798, %797 : vector<8x32xf32>
    %800 = math.tanh %799 : vector<8x32xf32>
    %cst_179 = arith.constant 1.000000e+00 : f32
    %801 = vector.broadcast %cst_179 : f32 to vector<8x32xf32>
    %802 = arith.subf %801, %794 : vector<8x32xf32>
    %803 = arith.mulf %802, %800 : vector<8x32xf32>
    %804 = arith.mulf %794, %719 : vector<8x32xf32>
    %805 = arith.addf %803, %804 : vector<8x32xf32>
    %806 = vector.broadcast %720 : i32 to vector<8x1xi32>
    %807 = arith.cmpi sgt, %22, %806 : vector<8x1xi32>
    %cst_180 = arith.constant 0.000000e+00 : f32
    %808 = vector.shape_cast %807 : vector<8x1xi1> to vector<8x1xi1>
    %809 = vector.broadcast %808 : vector<8x1xi1> to vector<8x32xi1>
    %810 = vector.broadcast %cst_180 : f32 to vector<8x32xf32>
    %811 = arith.select %809, %805, %810 : vector<8x32xi1>, vector<8x32xf32>
    %812 = arith.index_cast %720 : i32 to index
    %c0_181 = arith.constant 0 : index
    %c32_182 = arith.constant 32 : index
    %813 = vector.load %arg12[%812, %c0_181, %c32_182] : memref<8x8x64xf32, #tpu.memory_space<vmem>>, vector<1x8x32xf32>
    %814 = vector.shape_cast %813 : vector<1x8x32xf32> to vector<8x32xf32>
    %815 = vector.shape_cast %811 : vector<8x32xf32> to vector<1x8x32xf32>
    tpu.vector_store %arg12[%812, %c0_181, %c32_182], %815 {strides = array<i32>} : memref<8x8x64xf32, #tpu.memory_space<vmem>>, vector<1x8x32xf32>,
    %816 = vector.shape_cast %807 : vector<8x1xi1> to vector<8x1xi1>
    %817 = vector.broadcast %816 : vector<8x1xi1> to vector<8x32xi1>
    %818 = arith.select %817, %805, %719 : vector<8x32xi1>, vector<8x32xf32>
    %c8_i32 = arith.constant 8 : i32
    %c0_183 = arith.constant 0 : index
    %c0_184 = arith.constant 0 : index
    %c0_185 = arith.constant 0 : index
    %819 = vector.load %arg13[%c0_183, %c0_184, %c0_185] : memref<2x8x32xf32, #tpu.memory_space<vmem>>, vector<1x8x32xf32>
    %820 = vector.shape_cast %819 : vector<1x8x32xf32> to vector<8x32xf32>
    %821 = vector.shape_cast %769 : vector<8x32xf32> to vector<1x8x32xf32>
    tpu.vector_store %arg13[%c0_183, %c0_184, %c0_185], %821 {strides = array<i32>} : memref<2x8x32xf32, #tpu.memory_space<vmem>>, vector<1x8x32xf32>,
    %c1_186 = arith.constant 1 : index
    %c0_187 = arith.constant 0 : index
    %c0_188 = arith.constant 0 : index
    %822 = vector.load %arg13[%c1_186, %c0_187, %c0_188] : memref<2x8x32xf32, #tpu.memory_space<vmem>>, vector<1x8x32xf32>
    %823 = vector.shape_cast %822 : vector<1x8x32xf32> to vector<8x32xf32>
    %824 = vector.shape_cast %818 : vector<8x32xf32> to vector<1x8x32xf32>
    tpu.vector_store %arg13[%c1_186, %c0_187, %c0_188], %824 {strides = array<i32>} : memref<2x8x32xf32, #tpu.memory_space<vmem>>, vector<1x8x32xf32>,
    return
  }
  func.func @transform_0(%arg0: i32) -> (i32, i32) {
    %c0_i32 = arith.constant 0 : i32
    %c0_i32_0 = arith.constant 0 : i32
    return %arg0, %c0_i32 : i32, i32
  }
  func.func @transform_1(%arg0: i32) -> (i32, i32, i32) {
    %c0_i32 = arith.constant 0 : i32
    %c0_i32_0 = arith.constant 0 : i32
    %c0_i32_1 = arith.constant 0 : i32
    return %c0_i32, %arg0, %c0_i32_0 : i32, i32, i32
  }
  func.func @transform_2(%arg0: i32) -> (i32, i32, i32) {
    %c0_i32 = arith.constant 0 : i32
    %c0_i32_0 = arith.constant 0 : i32
    %c0_i32_1 = arith.constant 0 : i32
    return %c0_i32, %arg0, %c0_i32_0 : i32, i32, i32
  }
  func.func @transform_3(%arg0: i32) -> (i32, i32) {
    %c0_i32 = arith.constant 0 : i32
    %c0_i32_0 = arith.constant 0 : i32
    %c0_i32_1 = arith.constant 0 : i32
    return %c0_i32, %c0_i32_0 : i32, i32
  }
  func.func @transform_4(%arg0: i32) -> (i32, i32) {
    %c0_i32 = arith.constant 0 : i32
    %c0_i32_0 = arith.constant 0 : i32
    %c0_i32_1 = arith.constant 0 : i32
    return %c0_i32, %c0_i32_0 : i32, i32
  }
  func.func @transform_5(%arg0: i32) -> (i32, i32) {
    %c0_i32 = arith.constant 0 : i32
    %c0_i32_0 = arith.constant 0 : i32
    %c0_i32_1 = arith.constant 0 : i32
    return %c0_i32, %c0_i32_0 : i32, i32
  }
  func.func @transform_6(%arg0: i32) -> (i32, i32) {
    %c0_i32 = arith.constant 0 : i32
    %c0_i32_0 = arith.constant 0 : i32
    %c0_i32_1 = arith.constant 0 : i32
    return %c0_i32, %c0_i32_0 : i32, i32
  }
  func.func @transform_7(%arg0: i32) -> (i32, i32) {
    %c0_i32 = arith.constant 0 : i32
    %c0_i32_0 = arith.constant 0 : i32
    %c0_i32_1 = arith.constant 0 : i32
    return %c0_i32, %c0_i32_0 : i32, i32
  }
  func.func @transform_8(%arg0: i32) -> (i32, i32) {
    %c0_i32 = arith.constant 0 : i32
    %c0_i32_0 = arith.constant 0 : i32
    %c0_i32_1 = arith.constant 0 : i32
    return %c0_i32, %c0_i32_0 : i32, i32
  }
  func.func @transform_9(%arg0: i32) -> (i32, i32) {
    %c0_i32 = arith.constant 0 : i32
    %c0_i32_0 = arith.constant 0 : i32
    %c0_i32_1 = arith.constant 0 : i32
    return %c0_i32, %c0_i32_0 : i32, i32
  }
  func.func @transform_10(%arg0: i32) -> (i32, i32) {
    %c0_i32 = arith.constant 0 : i32
    %c0_i32_0 = arith.constant 0 : i32
    %c0_i32_1 = arith.constant 0 : i32
    return %c0_i32, %c0_i32_0 : i32, i32
  }
  func.func @transform_11(%arg0: i32) -> (i32, i32, i32) {
    %c0_i32 = arith.constant 0 : i32
    %c0_i32_0 = arith.constant 0 : i32
    %c0_i32_1 = arith.constant 0 : i32
    return %c0_i32, %arg0, %c0_i32_0 : i32, i32, i32
  }
  func.func @transform_12(%arg0: i32) -> (i32, i32, i32) {
    %c0_i32 = arith.constant 0 : i32
    %c0_i32_0 = arith.constant 0 : i32
    %c0_i32_1 = arith.constant 0 : i32
    return %c0_i32, %arg0, %c0_i32_0 : i32, i32, i32
  }
}

</mosaic_0001>

<bundles_post_ra>
// kernel: encoder_rnn_forward.1
= control target key start
LH: loop header
LB: loop body
LE: loop exit
PB: predicated region body
PF: predicated region fallthrough
CT: control target
= control target key end

     0   :  { %vm92_vm0 = vcmask 261120   ;;  %v2118_v8 = vmov 0.0   ;;  %vm2119_vm1 = vmmov 0   ;;  %v2120_v17 = vmov 0   ;;  %s2123_s16 = smov 96   ;;  %s2860_s3 = inlined_call_operand.vmem [shape: bf16[32,96], index: 3, kind: input, shape index: {}]   ;;  %s2861_s7 = inlined_call_operand.vmem [shape: bf16[32,96], index: 7, kind: input, shape index: {}]   ;;  %s2862_s1 = inlined_call_operand.vmem [shape: bf16[8,8,32], index: 1, kind: input, shape index: {}]   ;;  %s2863_s4 = inlined_call_operand.vmem [shape: bf16[32,96], index: 4, kind: input, shape index: {}]   ;;  %s2864_s8 = inlined_call_operand.vmem [shape: bf16[32,96], index: 8, kind: input, shape index: {}]   ;;  %s2865_s2 = inlined_call_operand.vmem [shape: f32[2,8,32], index: 2, kind: input, shape index: {}]   ;;  %s2866_s5 = inlined_call_operand.vmem [shape: f32[1,96], index: 5, kind: input, shape index: {}]   ;;  %s2867_s9 = inlined_call_operand.vmem [shape: f32[1,96], index: 9, kind: input, shape index: {}]   ;;  %s2868_s6 = inlined_call_operand.vmem [shape: f32[1,96], index: 6, kind: input, shape index: {}]   ;;  %s2869_s10 = inlined_call_operand.vmem [shape: f32[1,96], index: 10, kind: input, shape index: {}]   ;;  %s2870_s0 = inlined_call_operand.vmem [shape: s32[8,1], index: 0, kind: input, shape index: {}]   ;;  %s2871_s11 = inlined_call_operand.vmem [shape: f32[8,8,64], index: 11, kind: output, shape index: {0}]   ;;  %s2872_s12 = inlined_call_operand.vmem [shape: f32[2,8,32], index: 12, kind: output, shape index: {1}]  }
   0x1   :  { %v2004_v0 = vld [vmem:[%s2860_s3 + $0x8] sm:$0xff]   ;;  %v2006_v2 = vld [vmem:[%s2860_s3] sm:$0xff]   ;;  %v2012_v9 = vld [vmem:[%s2862_s1 + $0x10] sm:$0xff]   ;;  %2002 = vset.pattern.permute.xlu0 %v2120_v17  ;;  %2003 = vset.pattern.permute.xlu1 %v2120_v17  ;;  %vm266_vm2 = vcmask 781312   ;;  %vm515_vm6 = vcmask 523520  }
   0x2   :  { %v2005_v1 = vld [vmem:[%s2861_s7 + $0x8] sm:$0xff]   ;;  %1844 = vmatprep.subr.bf16.mxu0 %v2004_v0  ;;  %v2007_v3 = vld [vmem:[%s2861_s7] sm:$0xff]   ;;  %v2013_v12 = vld [vmem:[%s2862_s1 + $0x18] sm:$0xff]   ;;  %s2121_s7 = smov 64  }
   0x3   :  { %1856 = vmatprep.subr.bf16.mxu1 %v2005_v1  ;;  %1845 = vmatpush3.bf16.msra.mxu0 %v2004_v0  ;;  %v2008_v4 = vld [vmem:[%s2862_s1] sm:$0xff]   ;;  %v2009_v5 = vld [vmem:[%s2862_s1 + $0x8] sm:$0xff]  }
   0x4   :  { %1857 = vmatpush3.bf16.msra.mxu1 %v2005_v1  ;;  %1846 = vmatprep.subr.bf16.mxu0 %v2006_v2  ;;  %v2212_v6 = vld [vmem:[%s2863_s4 + $0x8] sm:$0xff]   ;;  %v2230_v10 = vld [vmem:[%s2863_s4] sm:$0xff]  }
   0x5   :  { %1858 = vmatprep.subr.bf16.mxu1 %v2007_v3  ;;  %1848 = vmatprep.mubr.msk.bf16.mxu0 %vm92_vm0, %v2008_v4  ;;  %v2217_v7 = vld [vmem:[%s2864_s8 + $0x8] sm:$0xff]   ;;  %v2237_v11 = vld [vmem:[%s2864_s8] sm:$0xff]  }
   0x6   :  { %1860 = vmatprep.mubr.msk.bf16.mxu1 %vm92_vm0, %v2008_v4  ;;  %v2256_v13 = vld [vmem:[%s2865_s2] sm:$0xff]  ;;  %v2263_v14 = vld [vmem:[%s2865_s2 + $0x8] sm:$0xff] }
   0x7   :  { %1847 = vmatpush3.bf16.msra.mxu0 %v2006_v2  ;;  %v306_v15 = vpack.c.bf16 %v2256_v13, %v2256_v13  ;;  %v414_v16 = vpack.c.bf16 %v2263_v14, %v2263_v14  ;;  %v1712_v18 = vld [vmem:[%s2866_s5] ss:$0 sm:$0xff] }
   0x8   :  { %1859 = vmatpush3.bf16.msra.mxu1 %v2007_v3  ;;  %1868 = vmatprep.subr.bf16.mxu0 %v2118_v8  ;;  %v2291_v19 = vld [vmem:[%s2867_s9] ss:$0 sm:$0xff] }
   0x9   :  { %1876 = vmatprep.subr.bf16.mxu1 %v2118_v8  ;;  %v2313_v61 = vld [vmem:[%s2868_s6] ss:$0 sm:$0xff] }
   0xa   :  { %1849 = vmatmul.mubr.msk.bf16.vlgmr.msra.gmra.mxu0 %vm92_vm0, %v2009_v5  ;;  %v2321_v4 = vld [vmem:[%s2869_s10] ss:$0 sm:$0xff] }
   0xb   :  { %1861 = vmatmul.mubr.msk.bf16.vlgmr.msra.gmra.mxu1 %vm92_vm0, %v2009_v5  ;;  %1869 = vmatpush3.bf16.msra.mxu0 %v2212_v6 }
   0xc   :  { %1877 = vmatpush3.bf16.msra.mxu1 %v2217_v7  ;;  %1852 = vmatprep.mubr.msk.bf16.mxu0 %vm92_vm0, %v2012_v9 }
   0xd   :  { %1864 = vmatprep.mubr.msk.bf16.mxu1 %vm92_vm0, %v2012_v9  ;;  %1870 = vmatprep.subr.bf16.mxu0 %v2118_v8 }
   0xe   :  { %1878 = vmatprep.subr.bf16.mxu1 %v2118_v8 }
   0xf   :  { %1871 = vmatpush3.bf16.msra.mxu0 %v2230_v10 }
  0x10   :  { %1879 = vmatpush3.bf16.msra.mxu1 %v2237_v11  ;;  %1884 = vmatprep.subr.bf16.mxu0 %v2118_v8 }
  0x11   :  { %1892 = vmatprep.subr.bf16.mxu1 %v2118_v8 }
  0x12   :  { %1853 = vmatmul.mubr.msk.bf16.gmra.mxu0 %vm92_vm0, %v2013_v12 }
  0x13   :  { %1865 = vmatmul.mubr.msk.bf16.gmra.mxu1 %vm92_vm0, %v2013_v12  ;;  %1872 = vmatprep.mubr.msk.bf16.mxu0 %vm2119_vm1, %v2118_v8 }
  0x14   :  { %1880 = vmatprep.mubr.msk.bf16.mxu1 %vm2119_vm1, %v2118_v8 }
  0x1a   :  { %1873 = vmatmul.mubr.msk.bf16.vlgmr.msra.gmra.mxu0 %vm92_vm0, %v306_v15 }
  0x1b   :  { %1881 = vmatmul.mubr.msk.bf16.vlgmr.msra.gmra.mxu1 %vm92_vm0, %v414_v16  ;;  %1885 = vmatpush3.bf16.msra.mxu0 %v2212_v6 }
  0x1c   :  { %1886 = vmatprep.subr.bf16.mxu0 %v2118_v8  ;;  %1893 = vmatpush3.bf16.msra.mxu1 %v2217_v7 }
  0x1d   :  { %1888 = vmatprep.mubr.msk.bf16.mxu0 %vm2119_vm1, %v2118_v8  ;;  %1894 = vmatprep.subr.bf16.mxu1 %v2118_v8 }
  0x1e   :  { %1896 = vmatprep.mubr.msk.bf16.mxu1 %vm2119_vm1, %v2118_v8 }
  0x1f   :  { %1887 = vmatpush3.bf16.msra.mxu0 %v2230_v10 }
  0x20   :  { %1895 = vmatpush3.bf16.msra.mxu1 %v2237_v11  ;;  %1900 = vmatprep.subr.bf16.mxu0 %v2118_v8 }
  0x21   :  { %1908 = vmatprep.subr.bf16.mxu1 %v2118_v8 }
  0xca   :  { %v1850_v20 = vpop.f32.mrf.mxu0 }
  0xcb   :  { %v148_v21 = vadd.f32 %v1850_v20, %v1712_v18  ;;  %v1862_v22 = vpop.f32.mrf.mxu1 }
  0xcc   :  { %v236_v23 = vadd.f32 %v1862_v22, %v2291_v19  ;;  %v139_v24 = vpop.f32.mrf.mxu0 }
  0xcd   :  { %v260_v25 = vpack.c.bf16 %v148_v21, %v148_v21  ;;  %v140_v26 = vadd.f32 %v1712_v18, %v139_v24  ;;  %v227_v27 = vpop.f32.mrf.mxu1 }
  0xce   :  { %v277_v28 = vpack.c.bf16 %v236_v23, %v236_v23  ;;  %v228_v29 = vadd.f32 %v2291_v19, %v227_v27  ;;  %v1851_v30 = vpop.f32.mrf.mxu0 }
  0xcf   :  { %269 = vst.msk [vmem:[#allocation2 + $0x8] sm:$0xf] %vm266_vm2, %v260_v25  ;;  %v258_v31 = vpack.c.bf16 %v140_v26, %v140_v26  ;;  %v151_v32 = vadd.f32 %v1851_v30, %v1712_v18  ;;  %v1863_v33 = vpop.f32.mrf.mxu1 }
  0xd0   :  { %285 = vst.msk [vmem:[#allocation3 + $0x8] sm:$0xf] %vm266_vm2, %v277_v28  ;;  %v275_v34 = vpack.c.bf16 %v228_v29, %v228_v29  ;;  %v239_v35 = vadd.f32 %v1863_v33, %v2291_v19  ;;  %v142_v36 = vpop.f32.mrf.mxu0 }
  0xd1   :  { %267 = vst.msk [vmem:[#allocation2] sm:$0xf] %vm266_vm2, %v258_v31  ;;  %v261_v37 = vpack.c.bf16 %v151_v32, %v151_v32  ;;  %v143_v38 = vadd.f32 %v1712_v18, %v142_v36  ;;  %v230_v39 = vpop.f32.mrf.mxu1 }
  0xd2   :  { %283 = vst.msk [vmem:[#allocation3] sm:$0xf] %vm266_vm2, %v275_v34  ;;  %v278_v40 = vpack.c.bf16 %v239_v35, %v239_v35  ;;  %v231_v41 = vadd.f32 %v2291_v19, %v230_v39  ;;  %v1854_v42 = vpop.f32.mrf.mxu0 }
  0xd3   :  { %270 = vst.msk [vmem:[#allocation2 + $0xc] sm:$0xf] %vm266_vm2, %v261_v37  ;;  %v259_v43 = vpack.c.bf16 %v143_v38, %v143_v38  ;;  %v164_v44 = vadd.f32 %v1854_v42, %v1712_v18  ;;  %v1866_v45 = vpop.f32.mrf.mxu1 }
  0xd4   :  { %286 = vst.msk [vmem:[#allocation3 + $0xc] sm:$0xf] %vm266_vm2, %v278_v40  ;;  %v276_v46 = vpack.c.bf16 %v231_v41, %v231_v41  ;;  %v252_v47 = vadd.f32 %v1866_v45, %v2291_v19  ;;  %v155_v48 = vpop.f32.mrf.mxu0 }
  0xd5   :  { %268 = vst.msk [vmem:[#allocation2 + $0x4] sm:$0xf] %vm266_vm2, %v259_v43  ;;  %v264_v49 = vpack.c.bf16 %v164_v44, %v164_v44  ;;  %v156_v50 = vadd.f32 %v1712_v18, %v155_v48  ;;  %v243_v51 = vpop.f32.mrf.mxu1 }
  0xd6   :  { %284 = vst.msk [vmem:[#allocation3 + $0x4] sm:$0xf] %vm266_vm2, %v276_v46  ;;  %v281_v52 = vpack.c.bf16 %v252_v47, %v252_v47  ;;  %v244_v53 = vadd.f32 %v2291_v19, %v243_v51  ;;  %v1855_v54 = vpop.f32.mrf.mxu0 }
  0xd7   :  { %273 = vst.msk [vmem:[#allocation2 + $0x18] sm:$0xf] %vm266_vm2, %v264_v49  ;;  %v262_v55 = vpack.c.bf16 %v156_v50, %v156_v50  ;;  %v167_v56 = vadd.f32 %v1855_v54, %v1712_v18  ;;  %v1867_v57 = vpop.f32.mrf.mxu1 }
  0xd8   :  { %289 = vst.msk [vmem:[#allocation3 + $0x18] sm:$0xf] %vm266_vm2, %v281_v52  ;;  %v279_v58 = vpack.c.bf16 %v244_v53, %v244_v53  ;;  %v255_v59 = vadd.f32 %v1867_v57, %v2291_v19  ;;  %v158_v60 = vpop.f32.mrf.mxu0  ;;  %v305_v26 = vld [vmem:[#allocation2] sm:$0xf] }
  0xd9   :  { %271 = vst.msk [vmem:[#allocation2 + $0x10] sm:$0xf] %vm266_vm2, %v262_v55  ;;  %v265_v62 = vpack.c.bf16 %v167_v56, %v167_v56  ;;  %v159_v63 = vadd.f32 %v1712_v18, %v158_v60  ;;  %v246_v0 = vpop.f32.mrf.mxu1  ;;  %v2329_v18 = vld [vmem:[%s2870_s0] sm:$0xff]  ;;  %s2122_s0 = smov 32   ;;  %v368_v28 = vunpack.c.l.bf16 %v305_v26 }
  0xda   :  { %287 = vst.msk [vmem:[#allocation3 + $0x10] sm:$0xf] %vm266_vm2, %v279_v58  ;;  %v282_v1 = vpack.c.bf16 %v255_v59, %v255_v59  ;;  %v247_v2 = vadd.f32 %v2291_v19, %v246_v0  ;;  %v362_v3 = vpop.f32.mrf.mxu0  ;;  %vm399_vm3 = vcmp.gt.s32.totalorder %v2329_v18, 0  ;;  %vm507_vm4 = vcmp.gt.s32.totalorder %v2329_v18, 7 }
  0xdb   :  { %274 = vst.msk [vmem:[#allocation2 + $0x1c] sm:$0xf] %vm266_vm2, %v265_v62  ;;  %v263_v5 = vpack.c.bf16 %v159_v63, %v159_v63  ;;  %v363_v9 = vadd.f32 %v2313_v61, %v362_v3  ;;  %v470_v12 = vpop.f32.mrf.mxu1  ;;  %v400_v25 = vsel %vm399_vm3, 1, %v2120_v17  ;;  %v508_v42 = vsel %vm507_vm4, 1, %v2120_v17 }
  0xdc   :  { %290 = vst.msk [vmem:[#allocation3 + $0x1c] sm:$0xf] %vm266_vm2, %v282_v1  ;;  %v280_v15 = vpack.c.bf16 %v247_v2, %v247_v2  ;;  %v1874_v16 = vpop.f32.mrf.mxu0  ;;  %v471_v19 = vadd.f32 %v2321_v4, %v470_v12  ;;  %vm594_vm8 = vcmp.gt.s32.totalorder %v2329_v18, 1  ;;  %vm684_vm9 = vcmp.gt.s32.totalorder %v2329_v18, 6 }
  0xdd   :  { %272 = vst.msk [vmem:[#allocation2 + $0x14] sm:$0xf] %vm266_vm2, %v263_v5  ;;  %v1882_v20 = vpop.f32.mrf.mxu1  ;;  %377 = vrot.lane.b32.xlu0 %v363_v9, %s2121_s7  ;;  %v369_v29 = vadd.f32 %v368_v28, %v363_v9  ;;  %vm770_vm12 = vcmp.gt.s32.totalorder %v2329_v18, 2  ;;  %vm860_vm13 = vcmp.gt.s32.totalorder %v2329_v18, 5  ;;  %vm1036_vm3 = vcmp.gt.s32.totalorder %v2329_v18, 4 }
  0xde   :  { %288 = vst.msk [vmem:[#allocation3 + $0x14] sm:$0xf] %vm266_vm2, %v280_v15  ;;  %v365_v21 = vpop.f32.mrf.mxu0  ;;  %vm946_vm2 = vcmp.gt.s32.totalorder %v2329_v18, 3 }
  0xdf   :  { %v473_v22 = vpop.f32.mrf.mxu1  ;;  %v1735_v31 = vmul.f32 -1.442695, %v369_v29 }
  0xe0   :  { %v1875_v23 = vpop.f32.mrf.mxu0 }
  0xe1   :  { %v1883_v24 = vpop.f32.mrf.mxu1  ;;  %485 = vrot.lane.b32.xlu0 %v471_v19, %s2121_s7  ;;  %2016 = vpow2.f32 %v1735_v31 }
  0xe3   :  { %v413_v27 = vld [vmem:[#allocation3 + $0x1c] sm:$0xf] }
  0xe4   :  { %v476_v30 = vunpack.c.l.bf16 %v413_v27  ;;  %v2393_v27 = vld [vmem:[#allocation2 + $0x4] sm:$0xff]  }
  0xe5   :  { %402 = vperm.xlu0 %2002, %v400_v25   ;;  %v2396_v29 = vld [vmem:[#allocation3 + $0x14] sm:$0xff]  }
  0xe6   :  { %v477_v32 = vadd.f32 %v476_v30, %v471_v19  ;;  %v657_v31 = vunpack.c.h.bf16 %v2396_v29 }
  0xe8   :  { %v1740_v33 = vmul.f32 -1.442695, %v477_v32 }
  0xe9   :  { %394 = vrot.lane.b32.xlu0 %v2256_v13, %s2122_s0 }
  0xea   :  { %2018 = vpow2.f32 %v1740_v33 }
  0xed   :  { %502 = vrot.lane.b32.xlu0 %v2263_v14, %s2122_s0 }
  0xee   :  { %v2017_v34 = vpop.eup %2016 }
  0xef   :  { %v373_v35 = vadd.f32 1.0, %v2017_v34 }
  0xf1   :  { %2020 = vrcp.f32 %v373_v35 }
  0xf7   :  { %v2019_v36 = vpop.eup %2018 }
  0xf8   :  { %v481_v37 = vadd.f32 1.0, %v2019_v36 }
  0xfa   :  { %2022 = vrcp.f32 %v481_v37 }
  0xfe   :  { %v2021_v38 = vpop.eup %2020 }
  0xff   :  { %v387_v52 = vsub.f32 1.0, %v2021_v38 }
 0x107   :  { %v2023_v14 = vpop.eup %2022 }
 0x108   :  { %v495_v58 = vsub.f32 1.0, %v2023_v14 }
 0x14f   :  { %v378_v13 = vpop.permute.xlu0 %377 }
 0x150   :  { %v380_v39 = vmul.f32 %v2021_v38, %v378_v13 }
 0x152   :  { %382 = vrot.lane.b32.xlu1 %v380_v39, %s2121_s7 }
 0x153   :  { %v486_v40 = vpop.permute.xlu0 %485 }
 0x154   :  { %v488_v41 = vmul.f32 %v2023_v14, %v486_v40 }
 0x156   :  { %490 = vrot.lane.b32.xlu1 %v488_v41, %s2121_s7 }
 0x15a   :  { %510 = vperm.xlu1 %2003, %v508_v42   ;;  %v595_v42 = vsel %vm594_vm8, 1, %v2120_v17 }
 0x160   :  { %v2346_v49 = vpop.permute.xlu0 %402 }
 0x161   :  { %vm404_vm5 = vcmp.eq.s32.totalorder %v2346_v49, 1 }
 0x164   :  { %v395_v51 = vpop.permute.xlu0 %394 }
 0x165   :  { %v397_v54 = vmul.f32 %v2021_v38, %v395_v51 }
 0x168   :  { %v503_v56 = vpop.permute.xlu0 %502 }
 0x169   :  { %v505_v60 = vmul.f32 %v2023_v14, %v503_v56 }
 0x1c4   :  { %v383_v43 = vpop.permute.xlu1 %382 }
 0x1c5   :  { %v385_v44 = vadd.f32 %v383_v43, %v368_v28  ;;  %v567_v28 = vunpack.c.l.bf16 %v2393_v27 }
 0x1c7   :  { %2024 = vtanh.f32 %v385_v44  ;;  %v685_v44 = vsel %vm684_vm9, 1, %v2120_v17 }
 0x1c8   :  { %v491_v45 = vpop.permute.xlu1 %490 }
 0x1c9   :  { %v493_v46 = vadd.f32 %v491_v45, %v476_v30 }
 0x1cb   :  { %2026 = vtanh.f32 %v493_v46 }
 0x1d4   :  { %v2025_v47 = vpop.eup %2024 }
 0x1d5   :  { %389 = vrot.lane.b32.xlu1 %v2025_v47, %s2123_s16  ;;  %v2348_v50 = vpop.permute.xlu1 %510 }
 0x1d6   :  { %vm512_vm7 = vcmp.eq.s32.totalorder %v2348_v50, 1 }
 0x1d8   :  { %v2027_v48 = vpop.eup %2026 }
 0x1d9   :  { %497 = vrot.lane.b32.xlu1 %v2027_v48, %s2123_s16 }
 0x247   :  { %v390_v53 = vpop.permute.xlu1 %389 }
 0x248   :  { %v392_v55 = vmul.f32 %v390_v53, %v387_v52 }
 0x24a   :  { %v2350_v57 = vadd.f32 %v397_v54, %v392_v55 }
 0x24b   :  { %v498_v59 = vpop.permute.xlu1 %497 }
 0x24c   :  { %v500_v62 = vmul.f32 %v498_v59, %v495_v58  ;;  %v2356_v63 = vsel %vm404_vm5, %v2350_v57, %v395_v51 }
 0x24d   :  { %v520_v0 = vpack.c.bf16 %v2356_v63, %v2356_v63 }
 0x24e   :  { %v506_v1 = vadd.f32 %v505_v60, %v500_v62 }
 0x24f   :  { %522 = vrot.lane.b32.xlu1 %v520_v0, %s2123_s16 }
 0x250   :  { %v513_v2 = vsel %vm512_vm7, %v506_v1, 0.0  ;;  %v2366_v3 = vsel %vm512_vm7, %v506_v1, %v503_v56 }
 0x251   :  { %1741 = vst.msk [vmem:[%s2871_s11 + $0x38] sm:$0xff] %vm515_vm6, %v513_v2  ;;  %v610_v5 = vpack.c.bf16 %v2366_v3, %v2366_v3 }
 0x253   :  { %612 = vrot.lane.b32.xlu0 %v610_v5, %s2123_s16 }
 0x2c1   :  { %v523_v9 = vpop.permute.xlu1 %522 }
 0x2c2   :  { %1889 = vmatmul.mubr.msk.bf16.vlgmr.msra.gmra.mxu0 %vm92_vm0, %v523_v9 }
 0x2c3   :  { %1901 = vmatpush3.bf16.msra.mxu0 %v2212_v6  ;;  %1904 = vmatprep.mubr.msk.bf16.mxu0 %vm2119_vm1, %v2118_v8 }
 0x2c4   :  { %1902 = vmatprep.subr.bf16.mxu0 %v2118_v8 }
 0x2c5   :  { %v613_v12 = vpop.permute.xlu0 %612 }
 0x2c6   :  { %1897 = vmatmul.mubr.msk.bf16.vlgmr.msra.gmra.mxu1 %vm92_vm0, %v613_v12 }
 0x2c7   :  { %1903 = vmatpush3.bf16.msra.mxu0 %v2230_v10  ;;  %1909 = vmatpush3.bf16.msra.mxu1 %v2217_v7 }
 0x2c8   :  { %1910 = vmatprep.subr.bf16.mxu1 %v2118_v8  ;;  %1912 = vmatprep.mubr.msk.bf16.mxu1 %vm2119_vm1, %v2118_v8 }
 0x2c9   :  { %1916 = vmatprep.subr.bf16.mxu0 %v2118_v8 }
 0x2cb   :  { %1911 = vmatpush3.bf16.msra.mxu1 %v2237_v11 }
 0x2cc   :  { %1924 = vmatprep.subr.bf16.mxu1 %v2118_v8 }
 0x382   :  { %v561_v15 = vpop.f32.mrf.mxu0 }
 0x383   :  { %v562_v16 = vadd.f32 %v2313_v61, %v561_v15 }
 0x384   :  { %v1890_v19 = vpop.f32.mrf.mxu0 }
 0x385   :  { %576 = vrot.lane.b32.xlu1 %v562_v16, %s2121_s7  ;;  %v568_v30 = vadd.f32 %v567_v28, %v562_v16 }
 0x386   :  { %v564_v20 = vpop.f32.mrf.mxu0  ;;  %v651_v21 = vpop.f32.mrf.mxu1 }
 0x387   :  { %v652_v22 = vadd.f32 %v2321_v4, %v651_v21  ;;  %v1743_v32 = vmul.f32 -1.442695, %v568_v30 }
 0x388   :  { %v1891_v23 = vpop.f32.mrf.mxu0  ;;  %v1898_v24 = vpop.f32.mrf.mxu1 }
 0x389   :  { %666 = vrot.lane.b32.xlu0 %v652_v22, %s2121_s7  ;;  %v658_v33 = vadd.f32 %v657_v31, %v652_v22  ;;  %2028 = vpow2.f32 %v1743_v32  ;;  %v743_v32 = vunpack.c.h.bf16 %v2393_v27 }
 0x38a   :  { %v654_v25 = vpop.f32.mrf.mxu1 }
 0x38b   :  { %v1746_v34 = vmul.f32 -1.442695, %v658_v33 }
 0x38c   :  { %v1899_v26 = vpop.f32.mrf.mxu1 }
 0x38d   :  { %2030 = vpow2.f32 %v1746_v34  ;;  %v833_v34 = vunpack.c.l.bf16 %v2396_v29 }
 0x396   :  { %v2029_v35 = vpop.eup %2028 }
 0x397   :  { %v572_v36 = vadd.f32 1.0, %v2029_v35 }
 0x399   :  { %2032 = vrcp.f32 %v572_v36 }
 0x39a   :  { %v2031_v37 = vpop.eup %2030 }
 0x39b   :  { %v662_v38 = vadd.f32 1.0, %v2031_v37 }
 0x39d   :  { %2034 = vrcp.f32 %v662_v38 }
 0x3a6   :  { %v2033_v13 = vpop.eup %2032 }
 0x3a7   :  { %v586_v54 = vsub.f32 1.0, %v2033_v13  ;;  %v592_v58 = vmul.f32 %v2033_v13, %v2356_v63 }
 0x3aa   :  { %v2035_v40 = vpop.eup %2034 }
 0x3ab   :  { %v676_v62 = vsub.f32 1.0, %v2035_v40  ;;  %v682_v1 = vmul.f32 %v2035_v40, %v2366_v3 }
 0x3f7   :  { %v577_v39 = vpop.permute.xlu1 %576 }
 0x3f8   :  { %v579_v14 = vmul.f32 %v2033_v13, %v577_v39 }
 0x3fa   :  { %581 = vrot.lane.b32.xlu1 %v579_v14, %s2121_s7 }
 0x3fb   :  { %v667_v41 = vpop.permute.xlu0 %666 }
 0x3fc   :  { %v669_v43 = vmul.f32 %v2035_v40, %v667_v41 }
 0x3fe   :  { %597 = vperm.xlu1 %2003, %v595_v42   ;;  %671 = vrot.lane.b32.xlu0 %v669_v43, %s2121_s7  ;;  %v771_v43 = vsel %vm770_vm12, 1, %v2120_v17 }
 0x402   :  { %687 = vperm.xlu0 %2002, %v685_v44  }
 0x46c   :  { %v582_v45 = vpop.permute.xlu1 %581 }
 0x46d   :  { %v584_v46 = vadd.f32 %v582_v45, %v567_v28  ;;  %v861_v45 = vsel %vm860_vm13, 1, %v2120_v17 }
 0x46f   :  { %2036 = vtanh.f32 %v584_v46 }
 0x470   :  { %v672_v47 = vpop.permute.xlu0 %671 }
 0x471   :  { %v674_v48 = vadd.f32 %v672_v47, %v657_v31 }
 0x473   :  { %2038 = vtanh.f32 %v674_v48 }
 0x479   :  { %v2407_v53 = vpop.permute.xlu1 %597 }
 0x47a   :  { %vm599_vm10 = vcmp.eq.s32.totalorder %v2407_v53, 1 }
 0x47c   :  { %v2037_v51 = vpop.eup %2036 }
 0x47d   :  { %588 = vrot.lane.b32.xlu1 %v2037_v51, %s2123_s16  ;;  %v2409_v55 = vpop.permute.xlu0 %687 }
 0x47e   :  { %vm689_vm11 = vcmp.eq.s32.totalorder %v2409_v55, 1 }
 0x480   :  { %v2039_v52 = vpop.eup %2038 }
 0x481   :  { %678 = vrot.lane.b32.xlu0 %v2039_v52, %s2123_s16 }
 0x4ef   :  { %v589_v56 = vpop.permute.xlu1 %588 }
 0x4f0   :  { %v591_v59 = vmul.f32 %v589_v56, %v586_v54 }
 0x4f2   :  { %v2412_v60 = vadd.f32 %v592_v58, %v591_v59 }
 0x4f3   :  { %v679_v0 = vpop.permute.xlu0 %678 }
 0x4f4   :  { %v681_v2 = vmul.f32 %v679_v0, %v676_v62  ;;  %v2420_v5 = vsel %vm599_vm10, %v2412_v60, %v2356_v63 }
 0x4f5   :  { %v696_v9 = vpack.c.bf16 %v2420_v5, %v2420_v5 }
 0x4f6   :  { %v683_v12 = vadd.f32 %v682_v1, %v681_v2 }
 0x4f7   :  { %698 = vrot.lane.b32.xlu1 %v696_v9, %s2123_s16 }
 0x4f8   :  { %v690_v15 = vsel %vm689_vm11, %v683_v12, 0.0  ;;  %v2431_v16 = vsel %vm689_vm11, %v683_v12, %v2366_v3 }
 0x4f9   :  { %1747 = vst.msk [vmem:[%s2871_s11 + $0x30] sm:$0xff] %vm515_vm6, %v690_v15  ;;  %v786_v63 = vpack.c.bf16 %v2431_v16, %v2431_v16 }
 0x4fb   :  { %788 = vrot.lane.b32.xlu0 %v786_v63, %s2123_s16 }
 0x569   :  { %v699_v19 = vpop.permute.xlu1 %698 }
 0x56a   :  { %1905 = vmatmul.mubr.msk.bf16.vlgmr.msra.gmra.mxu0 %vm92_vm0, %v699_v19 }
 0x56b   :  { %1917 = vmatpush3.bf16.msra.mxu0 %v2212_v6  ;;  %1920 = vmatprep.mubr.msk.bf16.mxu0 %vm2119_vm1, %v2118_v8 }
 0x56c   :  { %1918 = vmatprep.subr.bf16.mxu0 %v2118_v8 }
 0x56d   :  { %v789_v3 = vpop.permute.xlu0 %788 }
 0x56e   :  { %1913 = vmatmul.mubr.msk.bf16.vlgmr.msra.gmra.mxu1 %vm92_vm0, %v789_v3 }
 0x56f   :  { %1919 = vmatpush3.bf16.msra.mxu0 %v2230_v10  ;;  %1925 = vmatpush3.bf16.msra.mxu1 %v2217_v7 }
 0x570   :  { %1926 = vmatprep.subr.bf16.mxu1 %v2118_v8  ;;  %1928 = vmatprep.mubr.msk.bf16.mxu1 %vm2119_vm1, %v2118_v8 }
 0x571   :  { %1932 = vmatprep.subr.bf16.mxu0 %v2118_v8 }
 0x573   :  { %1927 = vmatpush3.bf16.msra.mxu1 %v2237_v11 }
 0x574   :  { %1940 = vmatprep.subr.bf16.mxu1 %v2118_v8 }
 0x62a   :  { %v737_v20 = vpop.f32.mrf.mxu0 }
 0x62b   :  { %v738_v21 = vadd.f32 %v2313_v61, %v737_v20 }
 0x62c   :  { %v1906_v22 = vpop.f32.mrf.mxu0 }
 0x62d   :  { %752 = vrot.lane.b32.xlu1 %v738_v21, %s2121_s7  ;;  %v744_v33 = vadd.f32 %v743_v32, %v738_v21 }
 0x62e   :  { %v740_v23 = vpop.f32.mrf.mxu0  ;;  %v827_v24 = vpop.f32.mrf.mxu1 }
 0x62f   :  { %v828_v25 = vadd.f32 %v2321_v4, %v827_v24  ;;  %v1749_v35 = vmul.f32 -1.442695, %v744_v33 }
 0x630   :  { %v1907_v26 = vpop.f32.mrf.mxu0  ;;  %v1914_v28 = vpop.f32.mrf.mxu1 }
 0x631   :  { %842 = vrot.lane.b32.xlu0 %v828_v25, %s2121_s7  ;;  %v834_v36 = vadd.f32 %v833_v34, %v828_v25  ;;  %2040 = vpow2.f32 %v1749_v35 }
 0x632   :  { %v830_v30 = vpop.f32.mrf.mxu1 }
 0x633   :  { %v1752_v37 = vmul.f32 -1.442695, %v834_v36  ;;  %v2519_v36 = vld [vmem:[#allocation2 + $0xc] sm:$0xff]  }
 0x634   :  { %v1915_v31 = vpop.f32.mrf.mxu1 }
 0x635   :  { %2042 = vpow2.f32 %v1752_v37  ;;  %v919_v37 = vunpack.c.l.bf16 %v2519_v36 }
 0x63e   :  { %v2041_v38 = vpop.eup %2040 }
 0x63f   :  { %v748_v13 = vadd.f32 1.0, %v2041_v38  ;;  %v2522_v38 = vld [vmem:[#allocation3 + $0xc] sm:$0xff]  }
 0x641   :  { %2044 = vrcp.f32 %v748_v13 }
 0x642   :  { %v2043_v39 = vpop.eup %2042 }
 0x643   :  { %v838_v14 = vadd.f32 1.0, %v2043_v39  ;;  %v1009_v39 = vunpack.c.h.bf16 %v2522_v38 }
 0x645   :  { %2046 = vrcp.f32 %v838_v14 }
 0x64e   :  { %v2045_v40 = vpop.eup %2044 }
 0x64f   :  { %v762_v58 = vsub.f32 1.0, %v2045_v40  ;;  %v768_v0 = vmul.f32 %v2045_v40, %v2420_v5 }
 0x652   :  { %v2047_v27 = vpop.eup %2046 }
 0x653   :  { %v852_v9 = vsub.f32 1.0, %v2047_v27  ;;  %v858_v15 = vmul.f32 %v2047_v27, %v2431_v16 }
 0x69f   :  { %v753_v41 = vpop.permute.xlu1 %752 }
 0x6a0   :  { %v755_v42 = vmul.f32 %v2045_v40, %v753_v41 }
 0x6a2   :  { %757 = vrot.lane.b32.xlu1 %v755_v42, %s2121_s7 }
 0x6a3   :  { %v843_v29 = vpop.permute.xlu0 %842 }
 0x6a4   :  { %v845_v44 = vmul.f32 %v2047_v27, %v843_v29 }
 0x6a6   :  { %773 = vperm.xlu1 %2003, %v771_v43   ;;  %847 = vrot.lane.b32.xlu0 %v845_v44, %s2121_s7 }
 0x6aa   :  { %863 = vperm.xlu0 %2002, %v861_v45  }
 0x714   :  { %v758_v46 = vpop.permute.xlu1 %757 }
 0x715   :  { %v760_v47 = vadd.f32 %v758_v46, %v743_v32 }
 0x717   :  { %2048 = vtanh.f32 %v760_v47 }
 0x718   :  { %v848_v48 = vpop.permute.xlu0 %847 }
 0x719   :  { %v850_v51 = vadd.f32 %v848_v48, %v833_v34 }
 0x71b   :  { %2050 = vtanh.f32 %v850_v51  ;;  %v947_v51 = vsel %vm946_vm2, 1, %v2120_v17 }
 0x721   :  { %v2468_v56 = vpop.permute.xlu1 %773 }
 0x722   :  { %vm775_vm14 = vcmp.eq.s32.totalorder %v2468_v56, 1 }
 0x724   :  { %v2049_v52 = vpop.eup %2048 }
 0x725   :  { %764 = vrot.lane.b32.xlu1 %v2049_v52, %s2123_s16  ;;  %v2470_v59 = vpop.permute.xlu0 %863 }
 0x726   :  { %vm865_vm15 = vcmp.eq.s32.totalorder %v2470_v59, 1 }
 0x728   :  { %v2051_v54 = vpop.eup %2050 }
 0x729   :  { %854 = vrot.lane.b32.xlu0 %v2051_v54, %s2123_s16  ;;  %v1037_v54 = vsel %vm1036_vm3, 1, %v2120_v17 }
 0x797   :  { %v765_v62 = vpop.permute.xlu1 %764 }
 0x798   :  { %v767_v1 = vmul.f32 %v765_v62, %v762_v58 }
 0x79a   :  { %v2473_v2 = vadd.f32 %v768_v0, %v767_v1 }
 0x79b   :  { %v855_v12 = vpop.permute.xlu0 %854 }
 0x79c   :  { %v857_v63 = vmul.f32 %v855_v12, %v852_v9  ;;  %v2481_v19 = vsel %vm775_vm14, %v2473_v2, %v2420_v5 }
 0x79d   :  { %v872_v3 = vpack.c.bf16 %v2481_v19, %v2481_v19 }
 0x79e   :  { %v859_v20 = vadd.f32 %v858_v15, %v857_v63 }
 0x79f   :  { %874 = vrot.lane.b32.xlu1 %v872_v3, %s2123_s16 }
 0x7a0   :  { %v866_v21 = vsel %vm865_vm15, %v859_v20, 0.0  ;;  %v2492_v22 = vsel %vm865_vm15, %v859_v20, %v2431_v16 }
 0x7a1   :  { %1753 = vst.msk [vmem:[%s2871_s11 + $0x28] sm:$0xff] %vm515_vm6, %v866_v21  ;;  %v962_v5 = vpack.c.bf16 %v2492_v22, %v2492_v22 }
 0x7a3   :  { %964 = vrot.lane.b32.xlu0 %v962_v5, %s2123_s16 }
 0x811   :  { %v875_v23 = vpop.permute.xlu1 %874 }
 0x812   :  { %1921 = vmatmul.mubr.msk.bf16.vlgmr.msra.gmra.mxu0 %vm92_vm0, %v875_v23 }
 0x813   :  { %1933 = vmatpush3.bf16.msra.mxu0 %v2212_v6  ;;  %1936 = vmatprep.mubr.msk.bf16.mxu0 %vm2119_vm1, %v2118_v8 }
 0x814   :  { %1934 = vmatprep.subr.bf16.mxu0 %v2118_v8 }
 0x815   :  { %v965_v16 = vpop.permute.xlu0 %964 }
 0x816   :  { %1929 = vmatmul.mubr.msk.bf16.vlgmr.msra.gmra.mxu1 %vm92_vm0, %v965_v16 }
 0x817   :  { %1935 = vmatpush3.bf16.msra.mxu0 %v2230_v10  ;;  %1941 = vmatpush3.bf16.msra.mxu1 %v2217_v7 }
 0x818   :  { %1942 = vmatprep.subr.bf16.mxu1 %v2118_v8  ;;  %1944 = vmatprep.mubr.msk.bf16.mxu1 %vm2119_vm1, %v2118_v8 }
 0x819   :  { %1948 = vmatprep.subr.bf16.mxu0 %v2118_v8 }
 0x81b   :  { %1943 = vmatpush3.bf16.msra.mxu1 %v2237_v11 }
 0x81c   :  { %1956 = vmatprep.subr.bf16.mxu1 %v2118_v8 }
 0x8d2   :  { %v913_v24 = vpop.f32.mrf.mxu0 }
 0x8d3   :  { %v914_v25 = vadd.f32 %v2313_v61, %v913_v24 }
 0x8d4   :  { %v1922_v26 = vpop.f32.mrf.mxu0 }
 0x8d5   :  { %928 = vrot.lane.b32.xlu1 %v914_v25, %s2121_s7  ;;  %v920_v13 = vadd.f32 %v919_v37, %v914_v25 }
 0x8d6   :  { %v916_v28 = vpop.f32.mrf.mxu0  ;;  %v1003_v30 = vpop.f32.mrf.mxu1 }
 0x8d7   :  { %v1004_v31 = vadd.f32 %v2321_v4, %v1003_v30  ;;  %v1755_v14 = vmul.f32 -1.442695, %v920_v13 }
 0x8d8   :  { %v1923_v32 = vpop.f32.mrf.mxu0  ;;  %v1930_v33 = vpop.f32.mrf.mxu1 }
 0x8d9   :  { %1018 = vrot.lane.b32.xlu0 %v1004_v31, %s2121_s7  ;;  %v1010_v40 = vadd.f32 %v1009_v39, %v1004_v31  ;;  %2052 = vpow2.f32 %v1755_v14 }
 0x8da   :  { %v1006_v34 = vpop.f32.mrf.mxu1 }
 0x8db   :  { %v1758_v41 = vmul.f32 -1.442695, %v1010_v40 }
 0x8dc   :  { %v1931_v35 = vpop.f32.mrf.mxu1 }
 0x8dd   :  { %2054 = vpow2.f32 %v1758_v41  ;;  %v1178_v41 = vunpack.c.l.bf16 %v2522_v38 }
 0x8e6   :  { %v2053_v42 = vpop.eup %2052 }
 0x8e7   :  { %v924_v27 = vadd.f32 1.0, %v2053_v42 }
 0x8e9   :  { %2056 = vrcp.f32 %v924_v27 }
 0x8ea   :  { %v2055_v29 = vpop.eup %2054 }
 0x8eb   :  { %v1014_v43 = vadd.f32 1.0, %v2055_v29 }
 0x8ed   :  { %2058 = vrcp.f32 %v1014_v43 }
 0x8f6   :  { %v2057_v44 = vpop.eup %2056 }
 0x8f7   :  { %v938_v18 = vsub.f32 1.0, %v2057_v44  ;;  %v944_v17 = vmul.f32 %v2057_v44, %v2481_v19 }
 0x8fa   :  { %v2059_v47 = vpop.eup %2058 }
 0x8fb   :  { %v1028_v5 = vsub.f32 1.0, %v2059_v47  ;;  %v1034_v16 = vmul.f32 %v2059_v47, %v2492_v22 }
 0x947   :  { %v929_v45 = vpop.permute.xlu1 %928 }
 0x948   :  { %v931_v46 = vmul.f32 %v2057_v44, %v929_v45 }
 0x94a   :  { %933 = vrot.lane.b32.xlu1 %v931_v46, %s2121_s7 }
 0x94b   :  { %v1019_v48 = vpop.permute.xlu0 %1018 }
 0x94c   :  { %v1021_v52 = vmul.f32 %v2059_v47, %v1019_v48 }
 0x94e   :  { %949 = vperm.xlu1 %2003, %v947_v51   ;;  %1023 = vrot.lane.b32.xlu0 %v1021_v52, %s2121_s7 }
 0x952   :  { %1039 = vperm.xlu0 %2002, %v1037_v54  }
 0x9bc   :  { %v934_v58 = vpop.permute.xlu1 %933 }
 0x9bd   :  { %v936_v62 = vadd.f32 %v934_v58, %v919_v37 }
 0x9bf   :  { %2060 = vtanh.f32 %v936_v62 }
 0x9c0   :  { %v1024_v0 = vpop.permute.xlu0 %1023 }
 0x9c1   :  { %v1026_v1 = vadd.f32 %v1024_v0, %v1009_v39 }
 0x9c3   :  { %2062 = vtanh.f32 %v1026_v1 }
 0x9c9   :  { %v2533_v15 = vpop.permute.xlu1 %949 }
 0x9ca   :  { %vm951_vm4 = vcmp.eq.s32.totalorder %v2533_v15, 1 }
 0x9cc   :  { %v2061_v9 = vpop.eup %2060 }
 0x9cd   :  { %940 = vrot.lane.b32.xlu1 %v2061_v9, %s2123_s16  ;;  %v2535_v63 = vpop.permute.xlu0 %1039 }
 0x9ce   :  { %vm1041_vm8 = vcmp.eq.s32.totalorder %v2535_v63, 1 }
 0x9d0   :  { %v2063_v12 = vpop.eup %2062 }
 0x9d1   :  { %1030 = vrot.lane.b32.xlu0 %v2063_v12, %s2123_s16 }
 0xa3f   :  { %v941_v3 = vpop.permute.xlu1 %940 }
 0xa40   :  { %v943_v20 = vmul.f32 %v941_v3, %v938_v18 }
 0xa42   :  { %v2538_v21 = vadd.f32 %v944_v17, %v943_v20 }
 0xa43   :  { %v1031_v23 = vpop.permute.xlu0 %1030 }
 0xa44   :  { %v1033_v24 = vmul.f32 %v1031_v23, %v1028_v5  ;;  %v2546_v25 = vsel %vm951_vm4, %v2538_v21, %v2481_v19 }
 0xa45   :  { %v1048_v26 = vpack.c.bf16 %v2546_v25, %v2546_v25 }
 0xa46   :  { %v1035_v28 = vadd.f32 %v1034_v16, %v1033_v24 }
 0xa47   :  { %1050 = vrot.lane.b32.xlu1 %v1048_v26, %s2123_s16 }
 0xa48   :  { %v1042_v30 = vsel %vm1041_vm8, %v1035_v28, 0.0  ;;  %v2557_v31 = vsel %vm1041_vm8, %v1035_v28, %v2492_v22 }
 0xa49   :  { %1759 = vst.msk [vmem:[%s2871_s11 + $0x20] sm:$0xff] %vm515_vm6, %v1042_v30  ;;  %v1131_v19 = vpack.c.bf16 %v2557_v31, %v2557_v31 }
 0xa4b   :  { %1133 = vrot.lane.b32.xlu0 %v1131_v19, %s2123_s16 }
 0xab9   :  { %v1051_v32 = vpop.permute.xlu1 %1050 }
 0xaba   :  { %1937 = vmatmul.mubr.msk.bf16.vlgmr.msra.gmra.mxu0 %vm92_vm0, %v1051_v32 }
 0xabb   :  { %1949 = vmatpush3.bf16.msra.mxu0 %v2212_v6  ;;  %1952 = vmatprep.mubr.msk.bf16.mxu0 %vm2119_vm1, %v2118_v8 }
 0xabc   :  { %1950 = vmatprep.subr.bf16.mxu0 %v2118_v8 }
 0xabd   :  { %v1134_v22 = vpop.permute.xlu0 %1133 }
 0xabe   :  { %1945 = vmatmul.mubr.msk.bf16.vlgmr.msra.gmra.mxu1 %vm92_vm0, %v1134_v22  ;;  %v2618_v22 = vld [vmem:[%s2863_s4 + $0x8] sm:$0xff]  }
 0xabf   :  { %1951 = vmatpush3.bf16.msra.mxu0 %v2230_v10  ;;  %1957 = vmatpush3.bf16.msra.mxu1 %v2217_v7 }
 0xac0   :  { %1958 = vmatprep.subr.bf16.mxu1 %v2118_v8  ;;  %1960 = vmatprep.mubr.msk.bf16.mxu1 %vm2119_vm1, %v2118_v8 }
 0xac1   :  { %1964 = vmatprep.subr.bf16.mxu0 %v2118_v8 }
 0xac3   :  { %1959 = vmatpush3.bf16.msra.mxu1 %v2237_v11  ;;  %v1095_v11 = vunpack.c.h.bf16 %v2519_v36 }
 0xac4   :  { %1972 = vmatprep.subr.bf16.mxu1 %v2118_v8 }
 0xb7a   :  { %v1089_v6 = vpop.f32.mrf.mxu0 }
 0xb7b   :  { %v1090_v33 = vadd.f32 %v2313_v61, %v1089_v6  ;;  %v2628_v6 = vld [vmem:[%s2863_s4] sm:$0xff]  }
 0xb7c   :  { %v1938_v34 = vpop.f32.mrf.mxu0 }
 0xb7d   :  { %1104 = vrot.lane.b32.xlu1 %v1090_v33, %s2121_s7  ;;  %v1096_v40 = vadd.f32 %v1095_v11, %v1090_v33  ;;  %v2634_v33 = vld [vmem:[%s2864_s8 + $0x8] sm:$0xff]   ;;  %v2644_v34 = vld [vmem:[%s2864_s8] sm:$0xff]  }
 0xb7e   :  { %v1092_v10 = vpop.f32.mrf.mxu0  ;;  %v1172_v35 = vpop.f32.mrf.mxu1 }
 0xb7f   :  { %v1173_v7 = vadd.f32 %v2321_v4, %v1172_v35  ;;  %v1761_v42 = vmul.f32 -1.442695, %v1096_v40 }
 0xb80   :  { %v1939_v37 = vpop.f32.mrf.mxu0  ;;  %v1946_v13 = vpop.f32.mrf.mxu1 }
 0xb81   :  { %1187 = vrot.lane.b32.xlu0 %v1173_v7, %s2121_s7  ;;  %v1179_v27 = vadd.f32 %v1178_v41, %v1173_v7  ;;  %2064 = vpow2.f32 %v1761_v42  ;;  %v2652_v42 = vld [vmem:[#allocation2 + $0x14] sm:$0xff]  }
 0xb82   :  { %v1175_v39 = vpop.f32.mrf.mxu1 }
 0xb83   :  { %v1764_v29 = vmul.f32 -1.442695, %v1179_v27  ;;  %v1257_v27 = vunpack.c.l.bf16 %v2652_v42 }
 0xb84   :  { %v1947_v14 = vpop.f32.mrf.mxu1 }
 0xb85   :  { %2066 = vpow2.f32 %v1764_v29  ;;  %v2655_v29 = vld [vmem:[#allocation3 + $0x4] sm:$0xff]  }
 0xb8e   :  { %v2065_v43 = vpop.eup %2064 }
 0xb8f   :  { %v1100_v44 = vadd.f32 1.0, %v2065_v43  ;;  %v1340_v43 = vunpack.c.h.bf16 %v2655_v29 }
 0xb91   :  { %2068 = vrcp.f32 %v1100_v44 }
 0xb92   :  { %v2067_v45 = vpop.eup %2066 }
 0xb93   :  { %v1183_v46 = vadd.f32 1.0, %v2067_v45 }
 0xb95   :  { %2070 = vrcp.f32 %v1183_v46 }
 0xb9e   :  { %v2069_v47 = vpop.eup %2068 }
 0xb9f   :  { %v1114_v12 = vsub.f32 1.0, %v2069_v47  ;;  %v1120_v3 = vmul.f32 %v2069_v47, %v2546_v25 }
 0xba2   :  { %v2071_v36 = vpop.eup %2070 }
 0xba3   :  { %v1197_v5 = vsub.f32 1.0, %v2071_v36  ;;  %v1203_v16 = vmul.f32 %v2071_v36, %v2557_v31 }
 0xbef   :  { %v1105_v48 = vpop.permute.xlu1 %1104 }
 0xbf0   :  { %v1107_v51 = vmul.f32 %v2069_v47, %v1105_v48 }
 0xbf2   :  { %1109 = vrot.lane.b32.xlu1 %v1107_v51, %s2121_s7 }
 0xbf3   :  { %v1188_v52 = vpop.permute.xlu0 %1187 }
 0xbf4   :  { %v1190_v54 = vmul.f32 %v2071_v36, %v1188_v52 }
 0xbf6   :  { %1192 = vrot.lane.b32.xlu0 %v1190_v54, %s2121_s7 }
 0xc64   :  { %v1110_v38 = vpop.permute.xlu1 %1109 }
 0xc65   :  { %v1112_v58 = vadd.f32 %v1110_v38, %v1095_v11 }
 0xc67   :  { %2072 = vtanh.f32 %v1112_v58 }
 0xc68   :  { %v1193_v62 = vpop.permute.xlu0 %1192 }
 0xc69   :  { %v1195_v0 = vadd.f32 %v1193_v62, %v1178_v41 }
 0xc6b   :  { %2074 = vtanh.f32 %v1195_v0 }
 0xc74   :  { %v2073_v1 = vpop.eup %2072 }
 0xc75   :  { %1116 = vrot.lane.b32.xlu1 %v2073_v1, %s2123_s16 }
 0xc78   :  { %v2075_v9 = vpop.eup %2074 }
 0xc79   :  { %1199 = vrot.lane.b32.xlu0 %v2075_v9, %s2123_s16 }
 0xce7   :  { %v1117_v18 = vpop.permute.xlu1 %1116 }
 0xce8   :  { %v1119_v17 = vmul.f32 %v1117_v18, %v1114_v12 }
 0xcea   :  { %v2591_v20 = vadd.f32 %v1120_v3, %v1119_v17 }
 0xceb   :  { %v1200_v23 = vpop.permute.xlu0 %1199 }
 0xcec   :  { %v1202_v24 = vmul.f32 %v1200_v23, %v1197_v5  ;;  %v2598_v26 = vsel %vm1041_vm8, %v2591_v20, %v2546_v25 }
 0xced   :  { %v1210_v28 = vpack.c.bf16 %v2598_v26, %v2598_v26 }
 0xcee   :  { %v2602_v30 = vadd.f32 %v1203_v16, %v1202_v24 }
 0xcef   :  { %1212 = vrot.lane.b32.xlu1 %v1210_v28, %s2123_s16 }
 0xcf0   :  { %v2609_v19 = vsel %vm951_vm4, %v2602_v30, %v2557_v31  ;;  %v1205_v56 = vsel %vm951_vm4, %v2602_v30, 0.0 }
 0xcf1   :  { %v1293_v32 = vpack.c.bf16 %v2609_v19, %v2609_v19 }
 0xcf3   :  { %1295 = vrot.lane.b32.xlu0 %v1293_v32, %s2123_s16 }
 0xd61   :  { %v1213_v25 = vpop.permute.xlu1 %1212 }
 0xd62   :  { %1953 = vmatmul.mubr.msk.bf16.vlgmr.msra.gmra.mxu0 %vm92_vm0, %v1213_v25 }
 0xd63   :  { %1965 = vmatpush3.bf16.msra.mxu0 %v2618_v22  ;;  %1968 = vmatprep.mubr.msk.bf16.mxu0 %vm2119_vm1, %v2118_v8 }
 0xd64   :  { %1966 = vmatprep.subr.bf16.mxu0 %v2118_v8 }
 0xd65   :  { %v1296_v31 = vpop.permute.xlu0 %1295 }
 0xd66   :  { %1961 = vmatmul.mubr.msk.bf16.vlgmr.msra.gmra.mxu1 %vm92_vm0, %v1296_v31 }
 0xd67   :  { %1967 = vmatpush3.bf16.msra.mxu0 %v2628_v6  ;;  %1973 = vmatpush3.bf16.msra.mxu1 %v2634_v33 }
 0xd68   :  { %1974 = vmatprep.subr.bf16.mxu1 %v2118_v8  ;;  %1976 = vmatprep.mubr.msk.bf16.mxu1 %vm2119_vm1, %v2118_v8 }
 0xd69   :  { %1980 = vmatprep.subr.bf16.mxu0 %v2118_v8 }
 0xd6b   :  { %1975 = vmatpush3.bf16.msra.mxu1 %v2644_v34 }
 0xd6c   :  { %1988 = vmatprep.subr.bf16.mxu1 %v2118_v8 }
 0xe22   :  { %v1251_v10 = vpop.f32.mrf.mxu0 }
 0xe23   :  { %v1252_v35 = vadd.f32 %v2313_v61, %v1251_v10 }
 0xe24   :  { %v1954_v7 = vpop.f32.mrf.mxu0 }
 0xe25   :  { %1266 = vrot.lane.b32.xlu1 %v1252_v35, %s2121_s7  ;;  %v1258_v61 = vadd.f32 %v1257_v27, %v1252_v35 }
 0xe26   :  { %v1254_v37 = vpop.f32.mrf.mxu0  ;;  %v1334_v13 = vpop.f32.mrf.mxu1 }
 0xe27   :  { %v1335_v39 = vadd.f32 %v2321_v4, %v1334_v13  ;;  %v1767_v44 = vmul.f32 -1.442695, %v1258_v61 }
 0xe28   :  { %v1955_v14 = vpop.f32.mrf.mxu0  ;;  %v1962_v11 = vpop.f32.mrf.mxu1 }
 0xe29   :  { %1349 = vrot.lane.b32.xlu0 %v1335_v39, %s2121_s7  ;;  %v1341_v45 = vadd.f32 %v1340_v43, %v1335_v39  ;;  %2076 = vpow2.f32 %v1767_v44 }
 0xe2a   :  { %v1337_v40 = vpop.f32.mrf.mxu1 }
 0xe2b   :  { %v1770_v46 = vmul.f32 -1.442695, %v1341_v45  ;;  %v2708_v40 = vld [vmem:[%s2869_s10] ss:$0 sm:$0xff]  ;;  %v1502_v45 = vunpack.c.l.bf16 %v2655_v29 }
 0xe2c   :  { %v1963_v41 = vpop.f32.mrf.mxu1 }
 0xe2d   :  { %2078 = vpow2.f32 %v1770_v46 }
 0xe36   :  { %v2077_v4 = vpop.eup %2076 }
 0xe37   :  { %v1262_v47 = vadd.f32 1.0, %v2077_v4 }
 0xe39   :  { %2080 = vrcp.f32 %v1262_v47 }
 0xe3a   :  { %v2079_v48 = vpop.eup %2078 }
 0xe3b   :  { %v1345_v51 = vadd.f32 1.0, %v2079_v48 }
 0xe3d   :  { %2082 = vrcp.f32 %v1345_v51 }
 0xe46   :  { %v2081_v36 = vpop.eup %2080 }
 0xe47   :  { %v1276_v17 = vsub.f32 1.0, %v2081_v36  ;;  %v1282_v23 = vmul.f32 %v2081_v36, %v2598_v26 }
 0xe4a   :  { %v2083_v38 = vpop.eup %2082 }
 0xe4b   :  { %v1359_v28 = vsub.f32 1.0, %v2083_v38  ;;  %v1365_v25 = vmul.f32 %v2083_v38, %v2609_v19 }
 0xe97   :  { %v1267_v52 = vpop.permute.xlu1 %1266 }
 0xe98   :  { %v1269_v54 = vmul.f32 %v2081_v36, %v1267_v52 }
 0xe9a   :  { %1271 = vrot.lane.b32.xlu1 %v1269_v54, %s2121_s7 }
 0xe9b   :  { %v1350_v58 = vpop.permute.xlu0 %1349 }
 0xe9c   :  { %v1352_v62 = vmul.f32 %v2083_v38, %v1350_v58 }
 0xe9e   :  { %1354 = vrot.lane.b32.xlu0 %v1352_v62, %s2121_s7 }
 0xf0c   :  { %v1272_v0 = vpop.permute.xlu1 %1271 }
 0xf0d   :  { %v1274_v1 = vadd.f32 %v1272_v0, %v1257_v27 }
 0xf0f   :  { %2084 = vtanh.f32 %v1274_v1 }
 0xf10   :  { %v1355_v9 = vpop.permute.xlu0 %1354 }
 0xf11   :  { %v1357_v12 = vadd.f32 %v1355_v9, %v1340_v43  ;;  %v1419_v43 = vunpack.c.h.bf16 %v2652_v42 }
 0xf13   :  { %2086 = vtanh.f32 %v1357_v12 }
 0xf1c   :  { %v2085_v18 = vpop.eup %2084 }
 0xf1d   :  { %1278 = vrot.lane.b32.xlu1 %v2085_v18, %s2123_s16 }
 0xf20   :  { %v2087_v3 = vpop.eup %2086 }
 0xf21   :  { %1361 = vrot.lane.b32.xlu0 %v2087_v3, %s2123_s16 }
 0xf8f   :  { %v1279_v5 = vpop.permute.xlu1 %1278 }
 0xf90   :  { %v1281_v16 = vmul.f32 %v1279_v5, %v1276_v17 }
 0xf92   :  { %v2663_v24 = vadd.f32 %v1282_v23, %v1281_v16 }
 0xf93   :  { %v1362_v32 = vpop.permute.xlu0 %1361 }
 0xf94   :  { %v1364_v31 = vmul.f32 %v1362_v32, %v1359_v28  ;;  %v2670_v10 = vsel %vm865_vm15, %v2663_v24, %v2598_v26 }
 0xf95   :  { %v1372_v35 = vpack.c.bf16 %v2670_v10, %v2670_v10 }
 0xf96   :  { %v2674_v7 = vadd.f32 %v1365_v25, %v1364_v31 }
 0xf97   :  { %1374 = vrot.lane.b32.xlu1 %v1372_v35, %s2123_s16 }
 0xf98   :  { %v2681_v37 = vsel %vm775_vm14, %v2674_v7, %v2609_v19 }
 0xf99   :  { %v1455_v13 = vpack.c.bf16 %v2681_v37, %v2681_v37 }
 0xf9b   :  { %1457 = vrot.lane.b32.xlu0 %v1455_v13, %s2123_s16 }
0x1009   :  { %v1375_v26 = vpop.permute.xlu1 %1374 }
0x100a   :  { %1969 = vmatmul.mubr.msk.bf16.vlgmr.msra.gmra.mxu0 %vm92_vm0, %v1375_v26 }
0x100b   :  { %1981 = vmatpush3.bf16.msra.mxu0 %v2618_v22  ;;  %1984 = vmatprep.mubr.msk.bf16.mxu0 %vm2119_vm1, %v2118_v8  ;;  %v2701_v22 = vld [vmem:[%s2868_s6] ss:$0 sm:$0xff] }
0x100c   :  { %1982 = vmatprep.subr.bf16.mxu0 %v2118_v8 }
0x100d   :  { %v1458_v39 = vpop.permute.xlu0 %1457 }
0x100e   :  { %1977 = vmatmul.mubr.msk.bf16.vlgmr.msra.gmra.mxu1 %vm92_vm0, %v1458_v39 }
0x100f   :  { %1983 = vmatpush3.bf16.msra.mxu0 %v2628_v6  ;;  %1989 = vmatpush3.bf16.msra.mxu1 %v2634_v33 }
0x1010   :  { %1990 = vmatprep.subr.bf16.mxu1 %v2118_v8  ;;  %1992 = vmatprep.mubr.msk.bf16.mxu1 %vm2119_vm1, %v2118_v8 }
0x1013   :  { %1991 = vmatpush3.bf16.msra.mxu1 %v2644_v34 }
0x10ca   :  { %v1413_v19 = vpop.f32.mrf.mxu0 }
0x10cb   :  { %v1414_v14 = vadd.f32 %v2701_v22, %v1413_v19 }
0x10cc   :  { %v1970_v11 = vpop.f32.mrf.mxu0 }
0x10cd   :  { %1428 = vrot.lane.b32.xlu1 %v1414_v14, %s2121_s7  ;;  %v1420_v44 = vadd.f32 %v1419_v43, %v1414_v14 }
0x10ce   :  { %v1416_v6 = vpop.f32.mrf.mxu0  ;;  %v1496_v33 = vpop.f32.mrf.mxu1 }
0x10cf   :  { %v1497_v8 = vadd.f32 %v2708_v40, %v1496_v33  ;;  %v1773_v46 = vmul.f32 -1.442695, %v1420_v44 }
0x10d0   :  { %v1971_v34 = vpop.f32.mrf.mxu0  ;;  %v1978_v41 = vpop.f32.mrf.mxu1 }
0x10d1   :  { %1511 = vrot.lane.b32.xlu0 %v1497_v8, %s2121_s7  ;;  %v1503_v4 = vadd.f32 %v1502_v45, %v1497_v8  ;;  %2088 = vpow2.f32 %v1773_v46 }
0x10d2   :  { %v1499_v27 = vpop.f32.mrf.mxu1 }
0x10d3   :  { %v1776_v47 = vmul.f32 -1.442695, %v1503_v4  ;;  %v1615_v4 = vld [vmem:[#allocation3] sm:$0xf] }
0x10d4   :  { %v1979_v61 = vpop.f32.mrf.mxu1 }
0x10d5   :  { %2090 = vpow2.f32 %v1776_v47 }
0x10de   :  { %v2089_v48 = vpop.eup %2088 }
0x10df   :  { %v1424_v51 = vadd.f32 1.0, %v2089_v48  ;;  %v1663_v48 = vunpack.c.l.bf16 %v1615_v4 }
0x10e1   :  { %2092 = vrcp.f32 %v1424_v51 }
0x10e2   :  { %v2091_v36 = vpop.eup %2090 }
0x10e3   :  { %v1507_v52 = vadd.f32 1.0, %v2091_v36 }
0x10e5   :  { %2094 = vrcp.f32 %v1507_v52 }
0x10ee   :  { %v2093_v54 = vpop.eup %2092 }
0x10ef   :  { %v1438_v17 = vsub.f32 1.0, %v2093_v54  ;;  %v1444_v23 = vmul.f32 %v2093_v54, %v2670_v10 }
0x10f2   :  { %v2095_v42 = vpop.eup %2094 }
0x10f3   :  { %v1521_v32 = vsub.f32 1.0, %v2095_v42  ;;  %v1527_v31 = vmul.f32 %v2095_v42, %v2681_v37 }
0x113f   :  { %v1429_v38 = vpop.permute.xlu1 %1428 }
0x1140   :  { %v1431_v58 = vmul.f32 %v2093_v54, %v1429_v38 }
0x1142   :  { %1433 = vrot.lane.b32.xlu1 %v1431_v58, %s2121_s7 }
0x1143   :  { %v1512_v62 = vpop.permute.xlu0 %1511 }
0x1144   :  { %v1514_v0 = vmul.f32 %v2095_v42, %v1512_v62 }
0x1146   :  { %1516 = vrot.lane.b32.xlu0 %v1514_v0, %s2121_s7 }
0x11b4   :  { %v1434_v29 = vpop.permute.xlu1 %1433 }
0x11b5   :  { %v1436_v1 = vadd.f32 %v1434_v29, %v1419_v43 }
0x11b7   :  { %2096 = vtanh.f32 %v1436_v1 }
0x11b8   :  { %v1517_v9 = vpop.permute.xlu0 %1516 }
0x11b9   :  { %v1519_v12 = vadd.f32 %v1517_v9, %v1502_v45  ;;  %v1533_v45 = vld [vmem:[#allocation2 + $0x1c] sm:$0xf] }
0x11ba   :  { %v1581_v46 = vunpack.c.l.bf16 %v1533_v45 }
0x11bb   :  { %2098 = vtanh.f32 %v1519_v12 }
0x11c4   :  { %v2097_v18 = vpop.eup %2096 }
0x11c5   :  { %1440 = vrot.lane.b32.xlu1 %v2097_v18, %s2123_s16 }
0x11c8   :  { %v2099_v3 = vpop.eup %2098 }
0x11c9   :  { %1523 = vrot.lane.b32.xlu0 %v2099_v3, %s2123_s16 }
0x1237   :  { %v1441_v5 = vpop.permute.xlu1 %1440 }
0x1238   :  { %v1443_v16 = vmul.f32 %v1441_v5, %v1438_v17 }
0x123a   :  { %v2719_v28 = vadd.f32 %v1444_v23, %v1443_v16  ;;  %v405_v23 = vsel %vm404_vm5, %v2350_v57, 0.0  ;;  %v776_v16 = vsel %vm775_vm14, %v2473_v2, 0.0  ;;  %v1122_v57 = vsel %vm1041_vm8, %v2591_v20, 0.0 }
0x123b   :  { %v1524_v25 = vpop.permute.xlu0 %1523  ;;  %v1284_v2 = vsel %vm865_vm15, %v2663_v24, 0.0 }
0x123c   :  { %v1526_v35 = vmul.f32 %v1524_v25, %v1521_v32  ;;  %v2726_v13 = vsel %vm689_vm11, %v2719_v28, %v2670_v10  ;;  %v600_v32 = vsel %vm599_vm10, %v2412_v60, 0.0  ;;  %v952_v25 = vsel %vm951_vm4, %v2538_v21, 0.0 }
0x123d   :  { %v1534_v26 = vpack.c.bf16 %v2726_v13, %v2726_v13  ;;  %v1446_v60 = vsel %vm689_vm11, %v2719_v28, 0.0 }
0x123e   :  { %v2730_v39 = vadd.f32 %v1527_v31, %v1526_v35 }
0x123f   :  { %1536 = vrot.lane.b32.xlu1 %v1534_v26, %s2123_s16 }
0x1240   :  { %v2737_v19 = vsel %vm599_vm10, %v2730_v39, %v2681_v37 }
0x1241   :  { %v1616_v14 = vpack.c.bf16 %v2737_v19, %v2737_v19 }
0x1243   :  { %1618 = vrot.lane.b32.xlu0 %v1616_v14, %s2123_s16 }
0x12b1   :  { %v1537_v10 = vpop.permute.xlu1 %1536 }
0x12b2   :  { %1985 = vmatmul.mubr.msk.bf16.vlgmr.msra.gmra.mxu0 %vm92_vm0, %v1537_v10 }
0x12b5   :  { %v1619_v11 = vpop.permute.xlu0 %1618 }
0x12b6   :  { %1993 = vmatmul.mubr.msk.bf16.vlgmr.msra.gmra.mxu1 %vm92_vm0, %v1619_v11 }
0x1372   :  { %v1575_v6 = vpop.f32.mrf.mxu0 }
0x1373   :  { %v1576_v33 = vadd.f32 %v2701_v22, %v1575_v6 }
0x1374   :  { %v1986_v8 = vpop.f32.mrf.mxu0 }
0x1375   :  { %1590 = vrot.lane.b32.xlu1 %v1576_v33, %s2121_s7  ;;  %v1582_v47 = vadd.f32 %v1581_v46, %v1576_v33  ;;  %v1367_v8 = vsel %vm775_vm14, %v2674_v7, 0.0 }
0x1376   :  { %v1578_v34 = vpop.f32.mrf.mxu0  ;;  %v1657_v37 = vpop.f32.mrf.mxu1 }
0x1377   :  { %v1658_v41 = vadd.f32 %v2708_v40, %v1657_v37  ;;  %v1779_v51 = vmul.f32 -1.442695, %v1582_v47  ;;  %v1529_v34 = vsel %vm599_vm10, %v2730_v39, 0.0 }
0x1378   :  { %v1987_v27 = vpop.f32.mrf.mxu0  ;;  %v1994_v61 = vpop.f32.mrf.mxu1 }
0x1379   :  { %1672 = vrot.lane.b32.xlu0 %v1658_v41, %s2121_s7  ;;  %v1664_v22 = vadd.f32 %v1663_v48, %v1658_v41  ;;  %2100 = vpow2.f32 %v1779_v51 }
0x137a   :  { %v1660_v43 = vpop.f32.mrf.mxu1 }
0x137b   :  { %v1782_v36 = vmul.f32 -1.442695, %v1664_v22 }
0x137c   :  { %v1995_v44 = vpop.f32.mrf.mxu1 }
0x137d   :  { %2102 = vpow2.f32 %v1782_v36 }
0x1386   :  { %v2101_v52 = vpop.eup %2100 }
0x1387   :  { %v1586_v54 = vadd.f32 1.0, %v2101_v52 }
0x1389   :  { %2104 = vrcp.f32 %v1586_v54 }
0x138a   :  { %v2103_v38 = vpop.eup %2102 }
0x138b   :  { %v1668_v40 = vadd.f32 1.0, %v2103_v38 }
0x138d   :  { %2106 = vrcp.f32 %v1668_v40 }
0x1396   :  { %v2105_v58 = vpop.eup %2104 }
0x1397   :  { %v1600_v63 = vsub.f32 1.0, %v2105_v58  ;;  %v1606_v21 = vmul.f32 %v2105_v58, %v2726_v13 }
0x139a   :  { %v2107_v0 = vpop.eup %2106 }
0x139b   :  { %v1682_v26 = vsub.f32 1.0, %v2107_v0  ;;  %v1688_v55 = vmul.f32 %v2107_v0, %v2737_v19 }
0x13e7   :  { %v1591_v42 = vpop.permute.xlu1 %1590 }
0x13e8   :  { %v1593_v62 = vmul.f32 %v2105_v58, %v1591_v42 }
0x13ea   :  { %1595 = vrot.lane.b32.xlu1 %v1593_v62, %s2121_s7 }
0x13eb   :  { %v1673_v29 = vpop.permute.xlu0 %1672 }
0x13ec   :  { %v1675_v1 = vmul.f32 %v2107_v0, %v1673_v29 }
0x13ee   :  { %1677 = vrot.lane.b32.xlu0 %v1675_v1, %s2121_s7 }
0x145c   :  { %v1596_v9 = vpop.permute.xlu1 %1595 }
0x145d   :  { %v1598_v12 = vadd.f32 %v1596_v9, %v1581_v46 }
0x145f   :  { %2108 = vtanh.f32 %v1598_v12 }
0x1460   :  { %v1678_v18 = vpop.permute.xlu0 %1677 }
0x1461   :  { %v1680_v3 = vadd.f32 %v1678_v18, %v1663_v48 }
0x1463   :  { %2110 = vtanh.f32 %v1680_v3 }
0x146c   :  { %v2109_v17 = vpop.eup %2108 }
0x146d   :  { %1602 = vrot.lane.b32.xlu1 %v2109_v17, %s2123_s16 }
0x1470   :  { %v2111_v5 = vpop.eup %2110 }
0x1471   :  { %407 = vrot.lane.b32.xlu1 %v405_v23, %s2123_s16  ;;  %1684 = vrot.lane.b32.xlu0 %v2111_v5, %s2123_s16 }
0x1475   :  { %778 = vrot.lane.b32.xlu1 %v776_v16, %s2123_s16  ;;  %602 = vrot.lane.b32.xlu0 %v600_v32, %s2123_s16 }
0x1479   :  { %1124 = vrot.lane.b32.xlu1 %v1122_v57, %s2123_s16  ;;  %954 = vrot.lane.b32.xlu0 %v952_v25, %s2123_s16 }
0x147d   :  { %1448 = vrot.lane.b32.xlu1 %v1446_v60, %s2123_s16  ;;  %1286 = vrot.lane.b32.xlu0 %v1284_v2, %s2123_s16 }
0x14df   :  { %v1603_v20 = vpop.permute.xlu1 %1602 }
0x14e0   :  { %v1605_v31 = vmul.f32 %v1603_v20, %v1600_v63 }
0x14e2   :  { %v1607_v35 = vadd.f32 %v1606_v21, %v1605_v31 }
0x14e3   :  { %v408_v14 = vpop.permute.xlu1 %407  ;;  %v1685_v10 = vpop.permute.xlu0 %1684 }
0x14e4   :  { %410 = vst.msk [vmem:[%s2871_s11] sm:$0xff] %vm92_vm0, %v408_v14  ;;  %v1687_v59 = vmul.f32 %v1685_v10, %v1682_v26  ;;  %v1614_v24 = vsel %vm512_vm7, %v1607_v35, %v2726_v13  ;;  %v1608_v28 = vsel %vm512_vm7, %v1607_v35, 0.0 }
0x14e5   :  { %1694 = vrot.lane.b32.xlu1 %v1614_v24, %s2123_s16  ;;  %1610 = vrot.lane.b32.xlu0 %v1608_v28, %s2123_s16 }
0x14e6   :  { %v1689_v11 = vadd.f32 %v1688_v55, %v1687_v59 }
0x14e7   :  { %v779_v6 = vpop.permute.xlu1 %778  ;;  %v603_v33 = vpop.permute.xlu0 %602 }
0x14e8   :  { %v1690_v13 = vsel %vm404_vm5, %v1689_v11, 0.0  ;;  %1750 = vst.msk [vmem:[%s2871_s11 + $0x10] sm:$0xff] %vm92_vm0, %v779_v6  ;;  %1744 = vst.msk [vmem:[%s2871_s11 + $0x8] sm:$0xff] %vm92_vm0, %v603_v33  ;;  %v1692_v50 = vsel %vm404_vm5, %v1689_v11, %v2737_v19 }
0x14e9   :  { %1691 = vst.msk [vmem:[%s2871_s11] sm:$0xff] %vm515_vm6, %v1690_v13  ;;  %1771 = vst.msk [vmem:[%s2871_s11 + $0x10] sm:$0xff] %vm515_vm6, %v1367_v8  ;;  %1699 = vrot.lane.b32.xlu0 %v1692_v50, %s2123_s16 }
0x14ea   :  { %1777 = vst.msk [vmem:[%s2871_s11 + $0x8] sm:$0xff] %vm515_vm6, %v1529_v34 }
0x14eb   :  { %v1125_v53 = vpop.permute.xlu1 %1124  ;;  %v955_v49 = vpop.permute.xlu0 %954 }
0x14ec   :  { %1762 = vst.msk [vmem:[%s2871_s11 + $0x20] sm:$0xff] %vm92_vm0, %v1125_v53  ;;  %1756 = vst.msk [vmem:[%s2871_s11 + $0x18] sm:$0xff] %vm92_vm0, %v955_v49 }
0x14ed   :  { %1765 = vst.msk [vmem:[%s2871_s11 + $0x18] sm:$0xff] %vm515_vm6, %v1205_v56 }
0x14ef   :  { %v1449_v7 = vpop.permute.xlu1 %1448  ;;  %v1287_v39 = vpop.permute.xlu0 %1286 }
0x14f0   :  { %1774 = vst.msk [vmem:[%s2871_s11 + $0x30] sm:$0xff] %vm92_vm0, %v1449_v7  ;;  %1768 = vst.msk [vmem:[%s2871_s11 + $0x28] sm:$0xff] %vm92_vm0, %v1287_v39 }
0x1557   :  { %v1695_v15 = vpop.permute.xlu1 %1694  ;;  %v1611_v30 = vpop.permute.xlu0 %1610 }
0x1558   :  { %1697 = vst.msk [vmem:[%s2872_s12] sm:$0xff] %vm92_vm0, %v1695_v15  ;;  %1780 = vst.msk [vmem:[%s2871_s11 + $0x38] sm:$0xff] %vm92_vm0, %v1611_v30 }
0x155b   :  { %v1700_v19 = vpop.permute.xlu0 %1699 }
0x155c   :  { %1783 = vst.msk [vmem:[%s2872_s12 + $0x8] sm:$0xff] %vm92_vm0, %v1700_v19 }

</bundles_post_ra>
